<compile_context>
chip_gen: v6e
topology: v6e:2x2x1
jax: 0.10.0
libtpu: 0.0.40
codegen_flags: <defaults>
</compile_context>

<pallas_src>
import math
from functools import partial

import numpy as np
import jax
import jax.numpy as jnp
from jax.experimental import pallas as pl
from jax.experimental.pallas import tpu as pltpu


CHUNK = 128                      # output-channel chunk (lane width) for grouped convs
_VMEM_LIMIT = 32 * 1024 * 1024   # explicit scoped-VMEM budget (fits v5e/v6e/v7x)


def _rnd_up(x, m):
    return (x + m - 1) // m * m


def _pick_tm(mp, cap=1024):
    """M tile: multiple of 16, <= cap.  mp must already be a multiple of 16."""
    if mp <= cap:
        return mp
    best = 16
    d = 16
    while d <= cap:
        if mp % d == 0:
            best = d
        d += 16
    # no decent divisor -> use the cap and let the caller pad M up to it
    return best if best >= 256 else cap


def _pick_tn(n):
    for t in (512, 256, 128):
        if n % t == 0:
            return t
    return n


def _cparams(sem):
    return pltpu.CompilerParams(dimension_semantics=sem,
                                vmem_limit_bytes=_VMEM_LIMIT)


# ----------------------------- Pallas kernels -----------------------------

def _conv_mm_kernel(a_ref, b_ref, bias_ref, *rest, relu, has_res):
    # One full-K MXU matmul per grid step; f32 accumulate, fused bias
    # (+ residual) (+ ReLU) epilogue in f32, bf16 store.
    if has_res:
        res_ref, o_ref = rest
    else:
        (o_ref,) = rest
    acc = jnp.dot(a_ref[...], b_ref[...], preferred_element_type=jnp.float32)
    acc = acc + bias_ref[...]
    if has_res:
        acc = acc + res_ref[...].astype(jnp.float32)
    if relu:
        acc = jnp.maximum(acc, 0.0)
    o_ref[...] = acc.astype(o_ref.dtype)


def _grouped_s1_kernel(x_ref, w_ref, b_ref, o_ref, *, wpad):
    """Implicit-GEMM grouped 3x3, stride 1, pad 1, for one (image, 128-ch chunk).

    x_ref : [R, 128]   flattened padded activation rows (R = (H+3)*(W+2))
    w_ref : [9, 128, 128] block-diagonal per-group weights for this chunk
    b_ref : [1, 128]
    o_ref : [H*(W+2), 128]  (the W..W+1 columns of each row are garbage and
                             are sliced away by the wrapper)
    Every 3x3 tap (ki,kj) of output row o is input row o + ki*wpad + kj.
    """
    mo = o_ref.shape[0]
    row_tile = 512
    base = 0
    while base < mo:                       # static python loop (unrolled)
        tr = min(row_tile, mo - base)
        acc = jnp.zeros((tr, CHUNK), jnp.float32)
        for p in range(9):
            off = base + (p // 3) * wpad + (p % 3)
            a = x_ref[off:off + tr, :]
            acc = acc + jnp.dot(a, w_ref[p],
                                preferred_element_type=jnp.float32)
        acc = acc + b_ref[...]
        o_ref[base:base + tr, :] = jnp.maximum(acc, 0.0).astype(o_ref.dtype)
        base += tr


def _head_kernel(x_ref, w_ref, b_ref, o_ref):
    # AvgPool2d((7,7),(1,1)) on a 7x7 map == mean over 49 positions, then fc.
    pooled = jnp.mean(x_ref[...].astype(jnp.float32), axis=1)
    o_ref[...] = jnp.dot(pooled.astype(jnp.bfloat16), w_ref[...],
                         preferred_element_type=jnp.float32) + b_ref[...]


# ----------------------------- matmul wrapper -----------------------------

def _matmul_bias(a, b, bias, *, relu, res=None, grouped_nj=None):
    """A[M,K] @ B + bias (+res) (+ReLU).  bf16 inputs, bf16 output, f32 math.

    grouped_nj=None : dense conv.  B is [K, N]; full-K block per step.
    grouped_nj=nj   : grouped 3x3 conv via im2col (stride-2 blocks only).
                      A's K layout is chunk-major; B is [nj*9*CHUNK, CHUNK]
                      and output chunk j only reads K slab j.
    """
    M = a.shape[0]
    Mp = _rnd_up(M, 16)
    tm = _pick_tm(Mp)
    Mp = _rnd_up(Mp, tm)
    if Mp != M:
        a = jnp.pad(a, ((0, Mp - M), (0, 0)))
        if res is not None:
            res = jnp.pad(res, ((0, Mp - M), (0, 0)))

    if grouped_nj is None:
        K, N = b.shape
        tn = _pick_tn(N)
        # keep >= 2 grid steps when possible (feeds both v7x TensorCores)
        if Mp // tm == 1 and N == tn and tn >= 256:
            tn //= 2
        n_j = N // tn
        a_spec = pl.BlockSpec((tm, K), lambda i, j: (i, 0))
        b_spec = pl.BlockSpec((K, tn), lambda i, j: (0, j))
    else:
        nj = grouped_nj
        kc = b.shape[0] // nj          # = 9 * CHUNK
        tn = b.shape[1]                # = CHUNK
        N = nj * tn
        n_j = nj
        a_spec = pl.BlockSpec((tm, kc), lambda i, j: (i, j))
        b_spec = pl.BlockSpec((kc, tn), lambda i, j: (j, 0))

    bias2 = bias.reshape(1, N)
    in_specs = [a_spec, b_spec, pl.BlockSpec((1, tn), lambda i, j: (0, j))]
    operands = [a, b, bias2]
    has_res = res is not None
    if has_res:
        in_specs.append(pl.BlockSpec((tm, tn), lambda i, j: (i, j)))
        operands.append(res)

    out = pl.pallas_call(
        partial(_conv_mm_kernel, relu=relu, has_res=has_res),
        out_shape=jax.ShapeDtypeStruct((Mp, N), jnp.bfloat16),
        grid_spec=pltpu.PrefetchScalarGridSpec(
            num_scalar_prefetch=0,
            grid=(Mp // tm, n_j),
            in_specs=in_specs,
            out_specs=pl.BlockSpec((tm, tn), lambda i, j: (i, j))),
        compiler_params=_cparams(("parallel", "parallel")),
    )(*operands)
    return out if Mp == M else out[:M]


# ------------------------------ im2col helpers ------------------------------

def _shifted_views(xp, k, stride, OH, OW):
    N = xp.shape[0]
    C = xp.shape[-1]
    views = []
    for ki in range(k):
        for kj in range(k):
            views.append(jax.lax.slice(
                xp, (0, ki, kj, 0),
                (N, ki + stride * (OH - 1) + 1, kj + stride * (OW - 1) + 1, C),
                (1, stride, stride, 1)))
    return views


def _im2col_stem(x, k, stride, padding, k_pad_to):
    N, H, W, C = x.shape
    xp = jnp.pad(x, ((0, 0), (padding, padding), (padding, padding), (0, 0)))
    OH = (H + 2 * padding - k) // stride + 1
    OW = (W + 2 * padding - k) // stride + 1
    cols = _shifted_views(xp, k, stride, OH, OW)
    K = k * k * C
    if k_pad_to > K:
        cols.append(jnp.zeros((N, OH, OW, k_pad_to - K), x.dtype))
    patches = jnp.concatenate(cols, axis=-1).reshape(N * OH * OW, k_pad_to)
    return patches, (N, OH, OW)


def _im2col_grouped(x, stride, chunk=CHUNK):
    """K layout: (chunk j, kernel position p, local channel c).  Stride-2 only."""
    N, H, W, C = x.shape
    nj = C // chunk
    xp = jnp.pad(x, ((0, 0), (1, 1), (1, 1), (0, 0)))
    OH = (H + 2 - 3) // stride + 1
    OW = (W + 2 - 3) // stride + 1
    views = _shifted_views(xp, 3, stride, OH, OW)
    cols = []
    for j in range(nj):
        for v in views:
            cols.append(v[..., j * chunk:(j + 1) * chunk])
    patches = jnp.concatenate(cols, axis=-1).reshape(N * OH * OW, nj * 9 * chunk)
    return patches, (N, OH, OW)


# ------------------------------ op wrappers ------------------------------

@jax.jit
def stem_conv_bn_relu(x, w, bias):
    # TODO(synk): the stem still materializes an 8 MB im2col patch matrix once.
    patches, (n, oh, ow) = _im2col_stem(x, 7, 2, 3, w.shape[0])
    out = _matmul_bias(patches, w, bias, relu=True)
    return out.reshape(n, oh, ow, w.shape[1])


@partial(jax.jit, static_argnames=("relu",))
def conv1x1_bn(x, w, bias, res, *, relu):
    N, H, W, C = x.shape
    a = x.reshape(N * H * W, C)
    r = None if res is None else res.reshape(N * H * W, w.shape[1])
    out = _matmul_bias(a, w, bias, relu=relu, res=r)
    return out.reshape(N, H, W, w.shape[1])


@jax.jit
def conv3x3_grouped_s1(x, wg, bias):
    """Grouped 3x3 conv, stride 1, pad 1, folded BN + ReLU (implicit GEMM)."""
    N, H, W, C = x.shape
    nj = C // CHUNK
    wpad = W + 2
    # 1 top / 2 bottom pad rows, 1 pad col each side; flatten spatial so every
    # tap is a constant row shift of one [rows, 128] slab (no im2col in HBM).
    xp = jnp.pad(x, ((0, 0), (1, 2), (1, 1), (0, 0)))
    R = (H + 3) * wpad
    xf = xp.reshape(N, R, C)
    mo = H * wpad
    out = pl.pallas_call(
        partial(_grouped_s1_kernel, wpad=wpad),
        out_shape=jax.ShapeDtypeStruct((N, mo, C), jnp.bfloat16),
        grid_spec=pltpu.PrefetchScalarGridSpec(
            num_scalar_prefetch=0,
            grid=(nj, N),
            in_specs=[
                pl.BlockSpec((None, R, CHUNK), lambda j, n: (n, 0, j)),
                pl.BlockSpec((None, 9, CHUNK, CHUNK), lambda j, n: (j, 0, 0, 0)),
                pl.BlockSpec((1, CHUNK), lambda j, n: (0, j)),
            ],
            out_specs=pl.BlockSpec((None, mo, CHUNK), lambda j, n: (n, 0, j))),
        compiler_params=_cparams(("parallel", "parallel")),
    )(xf, wg, bias.reshape(1, C))
    # drop the 2 garbage pad columns carried per output row
    return out.reshape(N, H, wpad, C)[:, :, :W, :]


@jax.jit
def conv3x3_grouped_s2(x, wg, bias):
    """Grouped 3x3 conv, stride 2 (3 transition blocks): compact im2col path."""
    N, H, W, C = x.shape
    nj = C // CHUNK
    patches, (n, oh, ow) = _im2col_grouped(x, 2)
    w2 = wg.reshape(nj * 9 * CHUNK, CHUNK)
    out = _matmul_bias(patches, w2, bias, relu=True, grouped_nj=nj)
    return out.reshape(n, oh, ow, C)


@jax.jit
def maxpool_3x3_s2(x):
    # MaxPool2d((3,3),(2,2),(1,1)) as a fused elementwise max over 9 strided
    # views (no patch materialization; per perf review this stays in XLA).
    N, H, W, C = x.shape
    xp = jnp.pad(x, ((0, 0), (1, 1), (1, 1), (0, 0)), constant_values=-1e30)
    OH = (H + 2 - 3) // 2 + 1
    OW = (W + 2 - 3) // 2 + 1
    views = _shifted_views(xp, 3, 2, OH, OW)
    out = views[0]
    for v in views[1:]:
        out = jnp.maximum(out, v)
    return out


@partial(jax.jit, static_argnames=("nc",))
def avgpool_fc(feat, w, b, *, nc):
    # feat: [N, 7, 7, 2048] bf16 -> avg_pool(7,7) -> flatten -> Linear(2048, nc)
    N, H, W, C = feat.shape
    x = feat.reshape(N, H * W, C)
    npad = w.shape[1]
    out = pl.pallas_call(
        _head_kernel,
        out_shape=jax.ShapeDtypeStruct((N, npad), jnp.float32),
        grid_spec=pltpu.PrefetchScalarGridSpec(
            num_scalar_prefetch=0, grid=(1,),
            in_specs=[pl.BlockSpec((N, H * W, C), lambda i: (0, 0, 0)),
                      pl.BlockSpec((C, npad), lambda i: (0, 0)),
                      pl.BlockSpec((1, npad), lambda i: (0, 0))],
            out_specs=pl.BlockSpec((N, npad), lambda i: (0, 0))),
        compiler_params=_cparams(("arbitrary",)),
    )(x, w, b)
    return out[:, :nc]


# -------------------------- parameter construction --------------------------

def _make_dense_conv_bn(rng, kh, kw, cin, cout, scale=1.0,
                        pad_k_to=None, pad_n_to=None):
    """Conv2d(bias=False) + folded eval-mode BN -> (bf16 [K, Cout], f32 bias)."""
    w = rng.normal(0.0, math.sqrt(2.0 / (kh * kw * cin)),
                   (kh, kw, cin, cout)).astype(np.float32)
    gamma = (1.0 + 0.02 * rng.standard_normal(cout)).astype(np.float32)
    beta = (0.02 * rng.standard_normal(cout)).astype(np.float32)
    w = w * gamma[None, None, None, :] * np.float32(scale)
    w2 = w.reshape(kh * kw * cin, cout)
    if pad_k_to is not None and pad_k_to > w2.shape[0]:
        w2 = np.concatenate(
            [w2, np.zeros((pad_k_to - w2.shape[0], cout), np.float32)], axis=0)
    if pad_n_to is not None and pad_n_to > cout:
        w2 = np.concatenate(
            [w2, np.zeros((w2.shape[0], pad_n_to - cout), np.float32)], axis=1)
        beta = np.concatenate([beta, np.zeros(pad_n_to - cout, np.float32)])
    return jnp.asarray(w2, jnp.bfloat16), jnp.asarray(beta, jnp.float32)


def _make_grouped_conv_bn(rng, width, groups=32, chunk=CHUNK):
    """Grouped 3x3 conv + folded BN, stored as [nj, 9, chunk, chunk].

    w[j, p, ci, co] is block-diagonal per group within chunk j; p = ki*3+kj
    exactly matches both the implicit-GEMM kernel's tap order and the
    stride-2 im2col column order.
    """
    ci = width // groups          # channels per group (in == out)
    nj = width // chunk
    wg = rng.normal(0.0, math.sqrt(2.0 / (9 * ci)),
                    (groups, 3, 3, ci, ci)).astype(np.float32)
    gamma = (1.0 + 0.02 * rng.standard_normal(width)).astype(np.float32)
    beta = (0.02 * rng.standard_normal(width)).astype(np.float32)
    wc = np.zeros((nj, 9, chunk, chunk), np.float32)
    for g in range(groups):
        lo = g * ci
        j, off = lo // chunk, lo % chunk
        w_g = wg[g] * gamma[lo:lo + ci][None, None, None, :]
        wc[j, :, off:off + ci, off:off + ci] = w_g.reshape(9, ci, ci)
    return jnp.asarray(wc, jnp.bfloat16), jnp.asarray(beta, jnp.float32)


def make_resnext101_32x4d_params(num_classes=2, seed=0):
    rng = np.random.default_rng(seed)
    params = {}
    # stem: 7x7/2 p3 conv + BN; K padded 147->160, Cout padded 64->128 (zeros)
    params['stem_w'], params['stem_b'] = _make_dense_conv_bn(
        rng, 7, 7, 3, 64, pad_k_to=160, pad_n_to=128)
    cfg = [  # (cin, group_width, cout, n_blocks, first_stride)
        (64, 128, 256, 3, 1),
        (256, 256, 512, 4, 2),
        (512, 512, 1024, 23, 2),
        (1024, 1024, 2048, 3, 2),
    ]
    stages = []
    for cin, width, cout, nblocks, stride in cfg:
        blocks = []
        for b in range(nblocks):
            bcin = cin if b == 0 else cout
            bstride = stride if b == 0 else 1
            kin_pad = 128 if bcin == 64 else None  # stem output is lane-padded
            p = {'stride': bstride}
            p['w1'], p['b1'] = _make_dense_conv_bn(rng, 1, 1, bcin, width,
                                                   pad_k_to=kin_pad)
            p['wg'], p['b2'] = _make_grouped_conv_bn(rng, width, groups=32)
            # keep residual branch small so 33 stacked blocks stay tame
            p['w3'], p['b3'] = _make_dense_conv_bn(rng, 1, 1, width, cout,
                                                   scale=0.25)
            if bstride != 1 or bcin != cout:
                p['ws'], p['bs'] = _make_dense_conv_bn(rng, 1, 1, bcin, cout,
                                                       pad_k_to=kin_pad)
            blocks.append(p)
        stages.append(blocks)
    params['stages'] = stages
    fc_w = np.zeros((2048, 128), np.float32)            # lane-padded classifier
    fc_w[:, :num_classes] = rng.normal(
        0.0, 1.0 / math.sqrt(2048.0), (2048, num_classes)).astype(np.float32)
    params['fc_w'] = jnp.asarray(fc_w, jnp.bfloat16)
    params['fc_b'] = jnp.zeros((1, 128), jnp.float32)
    params['num_classes'] = num_classes
    return params


# ------------------------------- forward pass -------------------------------

def _bottleneck_fwd(x, p):
    s = p['stride']
    out = conv1x1_bn(x, p['w1'], p['b1'], None, relu=True)
    if s == 1:
        out = conv3x3_grouped_s1(out, p['wg'], p['b2'])
    else:
        out = conv3x3_grouped_s2(out, p['wg'], p['b2'])
    if 'ws' in p:
        xs = x if s == 1 else x[:, ::s, ::s, :]
        sc = conv1x1_bn(xs, p['ws'], p['bs'], None, relu=False)
    else:
        sc = x
    # third 1x1 conv with residual add + ReLU fused into the matmul epilogue
    return conv1x1_bn(out, p['w3'], p['b3'], sc, relu=True)


def resnext101_forward(params, x_nchw):
    """Resnext101.forward: features -> avg_pool(7,7) -> flatten -> fc."""
    x = jnp.transpose(x_nchw, (0, 2, 3, 1)).astype(jnp.bfloat16)  # NCHW -> NHWC
    x = stem_conv_bn_relu(x, params['stem_w'], params['stem_b'])
    x = maxpool_3x3_s2(x)
    for blocks in params['stages']:
        for p in blocks:
            x = _bottleneck_fwd(x, p)
    return avgpool_fc(x, params['fc_w'], params['fc_b'],
                      nc=params['num_classes'])


if __name__ == "__main__":
    key = jax.random.PRNGKey(0)
    # batch=2; spatial must be 224 so the feature map is 7x7 for AvgPool2d((7,7)).
    x = jax.random.normal(key, (2, 3, 224, 224), dtype=jnp.float32)
    params = make_resnext101_32x4d_params(num_classes=2, seed=0)
    logits = resnext101_forward(params, x)
    logits = jax.block_until_ready(logits)
    assert logits.shape == (2, 2), logits.shape
    assert bool(jnp.all(jnp.isfinite(logits)))
    print("KERNEL_OK")
</pallas_src>

<mosaic_0001>
module attributes {stable_mosaic.version = 11 : i64} {
  func.func @_conv_mm_kernel(%arg0: i32, %arg1: i32, %arg2: memref<896x160xbf16, #tpu.memory_space<vmem>>, %arg3: memref<160x128xbf16, #tpu.memory_space<vmem>>, %arg4: memref<1x128xf32, #tpu.memory_space<vmem>>, %arg5: memref<896x128xbf16, #tpu.memory_space<vmem>>) attributes {dimension_semantics = [#tpu.dimension_semantics<parallel>, #tpu.dimension_semantics<parallel>], iteration_bounds = array<i64: 28, 1>, scalar_prefetch = 0 : i64, scratch_operands = 0 : i64, tpu.core_type = #tpu.core_type<tc>, window_params = [{transform_indices = @transform_0, window_bounds = array<i64: 896, 160>}, {transform_indices = @transform_1, window_bounds = array<i64: 160, 128>}, {transform_indices = @transform_2, window_bounds = array<i64: 1, 128>}, {transform_indices = @transform_3, window_bounds = array<i64: 896, 128>}]} {
    %c0 = arith.constant 0 : index
    %c0_0 = arith.constant 0 : index
    %0 = vector.load %arg2[%c0, %c0_0] : memref<896x160xbf16, #tpu.memory_space<vmem>>, vector<896x160xbf16>
    %c0_1 = arith.constant 0 : index
    %c0_2 = arith.constant 0 : index
    %1 = vector.load %arg3[%c0_1, %c0_2] : memref<160x128xbf16, #tpu.memory_space<vmem>>, vector<160x128xbf16>
    %cst = arith.constant dense<0.000000e+00> : vector<896x128xf32>
    %2 = tpu.matmul %0, %1, %cst {dimension_numbers = #tpu.dot_dimension_numbers<[1], [0], [0], [1], [0, 0, 1, 1], [], []>} : vector<896x160xbf16>, vector<160x128xbf16>, vector<896x128xf32> -> vector<896x128xf32>
    %c0_3 = arith.constant 0 : index
    %c0_4 = arith.constant 0 : index
    %3 = vector.load %arg4[%c0_3, %c0_4] : memref<1x128xf32, #tpu.memory_space<vmem>>, vector<1x128xf32>
    %4 = vector.broadcast %3 : vector<1x128xf32> to vector<896x128xf32>
    %5 = arith.addf %2, %4 : vector<896x128xf32>
    %cst_5 = arith.constant 0.000000e+00 : f32
    %6 = vector.broadcast %cst_5 : f32 to vector<896x128xf32>
    %7 = arith.maximumf %5, %6 : vector<896x128xf32>
    %8 = arith.truncf %7 : vector<896x128xf32> to vector<896x128xbf16>
    %c0_6 = arith.constant 0 : index
    %c0_7 = arith.constant 0 : index
    %9 = vector.load %arg5[%c0_6, %c0_7] : memref<896x128xbf16, #tpu.memory_space<vmem>>, vector<896x128xbf16>
    tpu.vector_store %arg5[%c0_6, %c0_7], %8 {strides = array<i32>} : memref<896x128xbf16, #tpu.memory_space<vmem>>, vector<896x128xbf16>,
    return
  }
  func.func @transform_0(%arg0: i32, %arg1: i32) -> (i32, i32) {
    %c0_i32 = arith.constant 0 : i32
    %c0_i32_0 = arith.constant 0 : i32
    return %arg0, %c0_i32 : i32, i32
  }
  func.func @transform_1(%arg0: i32, %arg1: i32) -> (i32, i32) {
    %c0_i32 = arith.constant 0 : i32
    %c0_i32_0 = arith.constant 0 : i32
    return %c0_i32, %arg1 : i32, i32
  }
  func.func @transform_2(%arg0: i32, %arg1: i32) -> (i32, i32) {
    %c0_i32 = arith.constant 0 : i32
    %c0_i32_0 = arith.constant 0 : i32
    return %c0_i32, %arg1 : i32, i32
  }
  func.func @transform_3(%arg0: i32, %arg1: i32) -> (i32, i32) {
    %c0_i32 = arith.constant 0 : i32
    return %arg0, %arg1 : i32, i32
  }
}

</mosaic_0001>

<bundles_post_ra>
// kernel: stem_conv_bn_relu.1
= control target key start
LH: loop header
LB: loop body
LE: loop exit
PB: predicated region body
PF: predicated region fallthrough
CT: control target
= control target key end

     0   :  { %8 = vsyncpa [#allocation3], 0  ;;  %s3970_s0 = inlined_call_operand.vmem [shape: bf16[25088,160], index: 0, kind: input, shape index: {}]   ;;  %s3971_s1 = inlined_call_operand.vmem [shape: bf16[160,128], index: 1, kind: input, shape index: {}]   ;;  %s3972_s2 = inlined_call_operand.vmem [shape: f32[1,128], index: 2, kind: input, shape index: {}]   ;;  %s3973_s3 = inlined_call_operand.hbm [shape: bf16[25088,128], index: 3, kind: output, shape index: {}]  }
   0x1   :  { %10 = vsyncpa [#allocation3 + $0x1], 0  ;;  %s3472_s12 = smov 0   ;;  %s3474_s13 = smov 0  }
   0x2   :  { %s3476_s14 = smov 0   ;;  %s3478_s15 = smov 0  }
   0x3   :  { %s3480_s16 = smov 0   ;;  %s3482_s17 = smov 0  }
   0x4 LB: > { %s2360_s18 = sadd.s32 4294967295, %s3446_s17   ;;  %s2361_s19 = sadd.s32 4294967294, %s3446_s17   ;;  %s3446_s17 = sphi %s3482_s17, %s16_s17   ;;  %s3442_s16 = sphi %s3480_s16, %s3980_s16   ;;  %s3438_s15 = sphi %s3478_s15, %s3979_s15   ;;  %s3434_s14 = sphi %s3476_s14, %s3978_s14   ;;  %s3430_s13 = sphi %s3474_s13, %s3977_s13   ;;  %s3426_s12 = sphi %s3472_s12, %s3976_s12  }
   0x5   : > { %s28_s20 = sadd.s32 1, %s3442_s16  ;;  %s115_s21 = sadd.s32 1, %s3434_s14 }
   0x6   : > { %p30_p0 = scmp.ge.s32.totalorder %s28_s20, 28  ;;  %p125_p1 = scmp.ne.s32.totalorder %s3434_s14, %s3430_s13 }
   0x7   : > { %p126_p2 = scmp.eq.s32.totalorder %s2360_s18, 27  ;;  %p131_p3 = scmp.ne.s32.totalorder %s3430_s13, %s3426_s12 }
   0x8   : > { %s3982_s20 = smov (%p30_p0, %s28_s20), 0  ;;  %p132_p5 = scmp.eq.s32.totalorder %s2361_s19, 27 }
   0x9   : > { %p3512_p4 = por %p126_p2, %p125_p1  ;;  %s110_s23 = ssub.s32 %s3442_s16, %s3982_s20 }
   0xa   : > { %p2366_p6 = scmp.ge.s32.totalorder %s3446_s17, 1  ;;  %p113_p7 = scmp.eq.s32.totalorder %s110_s23, 0 }
   0xb   : > { %p3519_p8 = por %p132_p5, %p131_p3  ;;  %p173_p9 = scmp.lt.s32.totalorder %s3446_s17, 29 }
   0xc   : > { %s3525_s25 = scalar_select %p113_p7, %s3434_s14, %s115_s21  }
   0xd   : > { %p174_p10 = pnand %p2366_p6, %p173_p9 }
   0xe   : > { %s205_s28 = smul.u32 (!%p174_p10), 112, %s3438_s15  ;;  %s202_s10 = sand.u32 (!%p174_p10), 1, %s3430_s13  }
   0xf   : > { %177 = sbr.rel (%p174_p10) target bundleno = 494 (0x1ee), region = 32  ;;  %s3449_s30 = smov (!%p174_p10), [#allocation2]  }
  0x10   : > { %p206_p11 = scmp.lt.s32.totalorder (!%p174_p10), %s205_s28, 3135  ;;  %s3132_s11 = smul.u32 (!%p174_p10), 448, %s202_s10 }
  0x11   : > { %s2776_s21 = smul.u32 (!%p174_p10), 7168, %s3438_s15  ;;  %s3925_s15 = scalar_lea.sflag (!%p174_p10), [#allocation3], %s202_s10 }
  0x12   : > { %s3735_s18 = scalar_lea.vmem (!%p174_p10), [#allocation2], %s3132_s11  ;;  %s3374_s4 = sshll.u32 (!%p174_p10), %s3449_s30, 4  ;;  %s3375_s4 = int_to_ptr.vmem [resolvable:$false] %s3374_s4 }
  0x13   : > { %s2261_s23 = sshll.u32 (!%p174_p10), %s3735_s18, 4  ;;  %s3376_s5 = scalar_lea.vmem (!%p174_p10), %s3375_s4, 14336  ;;  %s3919_s23 = int_to_ptr.vmem [resolvable:$true] %s2261_s23 }
  0x14   : > { %v3191_v0 = vld [vmem:[%s3971_s1 + $0x38] sm:$0xff]   ;;  %v3448_v1 = vmov 0   ;;  %v3192_v2 = vld [vmem:[%s3971_s1 + $0x30] sm:$0xff]   ;;  %s3984_s28 = smov (!%p206_p11, %s205_s28), 3135  ;;  %v3193_v3 = vld [vmem:[%s3971_s1 + $0x28] sm:$0xff]   ;;  %vm924_vm0 = vcmask 261120   ;;  %p3377_p1 = scmp.lt.s32.totalorder %s3919_s23, %s3375_s4 }
  0x15   : > { %1093 = vmatprep.subr.bf16.mxu0 %v3448_v1  ;;  %3112 = vmatprep.subr.bf16.mxu1 %v3448_v1  ;;  %s2663_s6 = sshll.u32 %s3984_s28, 3  ;;  %v3194_v4 = vld [vmem:[%s3971_s1 + $0x20] sm:$0xff]   ;;  %v3195_v7 = vld [vmem:[%s3971_s1 + $0x18] sm:$0xff]   ;;  %v3196_v8 = vld [vmem:[%s3971_s1 + $0x10] sm:$0xff]   ;;  %s3917_s28 = scalar_lea.hbm %s3973_s3, %s2776_s21 }
  0x16   : > { %1094 = vmatpush1.bf16.msra.mxu0 %v3191_v0  ;;  %3122 = vmatpush1.bf16.msra.mxu1 %v3191_v0  ;;  %s3540_s9 = scalar_lea.vmem %s3970_s0, %s2663_s6  ;;  %v3197_v9 = vld [vmem:[%s3971_s1 + $0x8] sm:$0xff]   ;;  %v3198_v10 = vld [vmem:[%s3971_s1] sm:$0xff]   ;;  %s3370_s29 = scalar_lea.vmem %s3919_s23, 7168 }
  0x17   : > { %1095 = vmatprep.subr.bf16.mxu0 %v3448_v1  ;;  %3113 = vmatprep.subr.bf16.mxu1 %v3448_v1  ;;  %v3203_v5 = vld [vmem:[%s3540_s9 + $0x4] ss:$8 sps:$4 sm:$0xff]   ;;  %v3201_v13 = vld [vmem:[%s3540_s9] ss:$8 sps:$4 sm:$0xff]   ;;  %v3207_v15 = vld [vmem:[%s3540_s9 + $0x14] ss:$8 sps:$4 sm:$0xff]   ;;  %p3371_p12 = scmp.ne.s32.totalorder %s3919_s23, %s3370_s29  ;;  %p3378_p2 = scmp.lt.s32.totalorder %s3376_s5, %s3370_s29 }
  0x18   : > { %v3206_v6 = vld [vmem:[%s3540_s9 + $0x1c4] ss:$8 sps:$4 sm:$0xff]   ;;  %2492 = vmatprep.mubr.msk.bf16.mxu0 %vm924_vm0, %v3203_v5  ;;  %v3204_v14 = vld [vmem:[%s3540_s9 + $0x1c0] ss:$8 sps:$4 sm:$0xff]   ;;  %v3209_v16 = vld [vmem:[%s3540_s9 + $0x1d4] ss:$8 sps:$4 sm:$0xff]  }
  0x19   : > { %2520 = vmatprep.mubr.msk.bf16.mxu1 %vm924_vm0, %v3206_v6  ;;  %v3199_v11 = vld [vmem:[%s3971_s1 + $0x48] sm:$0xff]   ;;  %v3200_v12 = vld [vmem:[%s3971_s1 + $0x40] sm:$0xff]   ;;  %v3211_v17 = vld [vmem:[%s3540_s9 + $0x10] ss:$8 sps:$4 sm:$0xff]   ;;  %p3372_p13 = pnand %p3371_p12, %p3512_p4  ;;  %p3379_p3 = por %p3378_p2, %p3377_p1 }
  0x1a   : > { %1096 = vmatpush1.bf16.msra.mxu0 %v3192_v2  ;;  %3123 = vmatpush1.bf16.msra.mxu1 %v3192_v2  ;;  %v3212_v18 = vld [vmem:[%s3540_s9 + $0x1d0] ss:$8 sps:$4 sm:$0xff]   ;;  %v3213_v19 = vld [vmem:[%s3540_s9 + $0x24] ss:$8 sps:$4 sm:$0xff]   ;;  %v3217_v21 = vld [vmem:[%s3540_s9 + $0x20] ss:$8 sps:$4 sm:$0xff]  }
  0x1b   : > { %1097 = vmatprep.subr.bf16.mxu0 %v3448_v1  ;;  %3114 = vmatprep.subr.bf16.mxu1 %v3448_v1  ;;  %v3215_v20 = vld [vmem:[%s3540_s9 + $0x1e4] ss:$8 sps:$4 sm:$0xff]   ;;  %v3218_v22 = vld [vmem:[%s3540_s9 + $0x1e0] ss:$8 sps:$4 sm:$0xff]   ;;  %v3219_v23 = vld [vmem:[%s3540_s9 + $0x34] ss:$8 sps:$4 sm:$0xff]   ;;  %p3373_p0 = pneg %p3372_p13 }
  0x1c   : > { %v3221_v24 = vld [vmem:[%s3540_s9 + $0x1f4] ss:$8 sps:$4 sm:$0xff]   ;;  %v3223_v25 = vld [vmem:[%s3540_s9 + $0x30] ss:$8 sps:$4 sm:$0xff]   ;;  %v3225_v27 = vld [vmem:[%s3540_s9 + $0x44] ss:$8 sps:$4 sm:$0xff]  }
  0x1d   : > { %v3224_v26 = vld [vmem:[%s3540_s9 + $0x1f0] ss:$8 sps:$4 sm:$0xff]   ;;  %v3227_v28 = vld [vmem:[%s3540_s9 + $0x204] ss:$8 sps:$4 sm:$0xff]   ;;  %v3229_v29 = vld [vmem:[%s3540_s9 + $0x40] ss:$8 sps:$4 sm:$0xff]   ;;  %p3380_p5 = pnand %p3379_p3, %p3373_p0 }
  0x1e   : > { %1098 = vmatpush1.bf16.msra.mxu0 %v3193_v3  ;;  %3124 = vmatpush1.bf16.msra.mxu1 %v3193_v3  ;;  %v3230_v30 = vld [vmem:[%s3540_s9 + $0x200] ss:$8 sps:$4 sm:$0xff]   ;;  %v3231_v31 = vld [vmem:[%s3540_s9 + $0x54] ss:$8 sps:$4 sm:$0xff]   ;;  %v3235_v33 = vld [vmem:[%s3540_s9 + $0x50] ss:$8 sps:$4 sm:$0xff]  }
  0x1f   : > { %1099 = vmatprep.subr.bf16.mxu0 %v3448_v1  ;;  %3115 = vmatprep.subr.bf16.mxu1 %v3448_v1  ;;  %v3233_v32 = vld [vmem:[%s3540_s9 + $0x214] ss:$8 sps:$4 sm:$0xff]   ;;  %v3236_v34 = vld [vmem:[%s3540_s9 + $0x210] ss:$8 sps:$4 sm:$0xff]   ;;  %v3237_v35 = vld [vmem:[%s3540_s9 + $0x64] ss:$8 sps:$4 sm:$0xff]  }
  0x20   : > { %v3239_v36 = vld [vmem:[%s3540_s9 + $0x224] ss:$8 sps:$4 sm:$0xff]   ;;  %v3241_v37 = vld [vmem:[%s3540_s9 + $0x60] ss:$8 sps:$4 sm:$0xff]   ;;  %v3243_v39 = vld [vmem:[%s3540_s9 + $0x74] ss:$8 sps:$4 sm:$0xff]  }
  0x21   : > { %v3242_v38 = vld [vmem:[%s3540_s9 + $0x220] ss:$8 sps:$4 sm:$0xff]   ;;  %v3245_v40 = vld [vmem:[%s3540_s9 + $0x234] ss:$8 sps:$4 sm:$0xff]   ;;  %v3247_v41 = vld [vmem:[%s3540_s9 + $0x70] ss:$8 sps:$4 sm:$0xff]  }
  0x22   : > { %1100 = vmatpush1.bf16.msra.mxu0 %v3194_v4  ;;  %3125 = vmatpush1.bf16.msra.mxu1 %v3194_v4  ;;  %v3248_v42 = vld [vmem:[%s3540_s9 + $0x230] ss:$8 sps:$4 sm:$0xff]   ;;  %v3249_v43 = vld [vmem:[%s3540_s9 + $0x84] ss:$8 sps:$4 sm:$0xff]   ;;  %v3253_v45 = vld [vmem:[%s3540_s9 + $0x80] ss:$8 sps:$4 sm:$0xff]  }
  0x23   : > { %1101 = vmatprep.subr.bf16.mxu0 %v3448_v1  ;;  %3116 = vmatprep.subr.bf16.mxu1 %v3448_v1  ;;  %v3251_v44 = vld [vmem:[%s3540_s9 + $0x244] ss:$8 sps:$4 sm:$0xff]   ;;  %v3254_v46 = vld [vmem:[%s3540_s9 + $0x240] ss:$8 sps:$4 sm:$0xff]   ;;  %v3255_v47 = vld [vmem:[%s3540_s9 + $0x94] ss:$8 sps:$4 sm:$0xff]  }
  0x24   : > { %v3257_v48 = vld [vmem:[%s3540_s9 + $0x254] ss:$8 sps:$4 sm:$0xff]   ;;  %v3259_v49 = vld [vmem:[%s3540_s9 + $0x90] ss:$8 sps:$4 sm:$0xff]   ;;  %v3261_v51 = vld [vmem:[%s3540_s9 + $0xa4] ss:$8 sps:$4 sm:$0xff]  }
  0x25   : > { %v3260_v50 = vld [vmem:[%s3540_s9 + $0x250] ss:$8 sps:$4 sm:$0xff]   ;;  %v3263_v52 = vld [vmem:[%s3540_s9 + $0x264] ss:$8 sps:$4 sm:$0xff]   ;;  %v3265_v53 = vld [vmem:[%s3540_s9 + $0xa0] ss:$8 sps:$4 sm:$0xff]  }
  0x26   : > { %1102 = vmatpush1.bf16.msra.mxu0 %v3195_v7  ;;  %3126 = vmatpush1.bf16.msra.mxu1 %v3195_v7  ;;  %v3266_v54 = vld [vmem:[%s3540_s9 + $0x260] ss:$8 sps:$4 sm:$0xff]   ;;  %v3267_v55 = vld [vmem:[%s3540_s9 + $0xb4] ss:$8 sps:$4 sm:$0xff]   ;;  %v3271_v57 = vld [vmem:[%s3540_s9 + $0xb0] ss:$8 sps:$4 sm:$0xff]  }
  0x27   : > { %1103 = vmatprep.subr.bf16.mxu0 %v3448_v1  ;;  %3117 = vmatprep.subr.bf16.mxu1 %v3448_v1  ;;  %v3269_v56 = vld [vmem:[%s3540_s9 + $0x274] ss:$8 sps:$4 sm:$0xff]   ;;  %v3272_v58 = vld [vmem:[%s3540_s9 + $0x270] ss:$8 sps:$4 sm:$0xff]   ;;  %v3273_v59 = vld [vmem:[%s3540_s9 + $0xc4] ss:$8 sps:$4 sm:$0xff]  }
  0x28   : > { %v3275_v60 = vld [vmem:[%s3540_s9 + $0x284] ss:$8 sps:$4 sm:$0xff]   ;;  %v3277_v61 = vld [vmem:[%s3540_s9 + $0xc0] ss:$8 sps:$4 sm:$0xff]   ;;  %v3279_v63 = vld [vmem:[%s3540_s9 + $0xd4] ss:$8 sps:$4 sm:$0xff]  }
  0x29   : > { %v3278_v62 = vld [vmem:[%s3540_s9 + $0x280] ss:$8 sps:$4 sm:$0xff]   ;;  %v3281_v0 = vld [vmem:[%s3540_s9 + $0x294] ss:$8 sps:$4 sm:$0xff]   ;;  %v3284_v2 = vld [vmem:[%s3540_s9 + $0x290] ss:$8 sps:$4 sm:$0xff]  }
  0x2a   : > { %1104 = vmatpush1.bf16.msra.mxu0 %v3196_v8  ;;  %3127 = vmatpush1.bf16.msra.mxu1 %v3196_v8  ;;  %v3285_v3 = vld [vmem:[%s3540_s9 + $0xe4] ss:$8 sps:$4 sm:$0xff]   ;;  %v3289_v5 = vld [vmem:[%s3540_s9 + $0xe0] ss:$8 sps:$4 sm:$0xff]   ;;  %v3291_v7 = vld [vmem:[%s3540_s9 + $0xf4] ss:$8 sps:$4 sm:$0xff]  }
  0x2b   : > { %1105 = vmatprep.subr.bf16.mxu0 %v3448_v1  ;;  %3118 = vmatprep.subr.bf16.mxu1 %v3448_v1  ;;  %v3287_v4 = vld [vmem:[%s3540_s9 + $0x2a4] ss:$8 sps:$4 sm:$0xff]   ;;  %v3290_v6 = vld [vmem:[%s3540_s9 + $0x2a0] ss:$8 sps:$4 sm:$0xff]   ;;  %v3293_v8 = vld [vmem:[%s3540_s9 + $0x2b4] ss:$8 sps:$4 sm:$0xff]  }
  0x2e   : > { %1106 = vmatpush1.bf16.msra.mxu0 %v3197_v9  ;;  %3128 = vmatpush1.bf16.msra.mxu1 %v3197_v9  ;;  %v3295_v9 = vld [vmem:[%s3540_s9 + $0xf0] ss:$8 sps:$4 sm:$0xff]  }
  0x2f   : > { %1107 = vmatprep.subr.bf16.mxu0 %v3448_v1  ;;  %3119 = vmatprep.subr.bf16.mxu1 %v3448_v1 }
  0x32   : > { %1108 = vmatpush1.bf16.msra.mxu0 %v3198_v10  ;;  %3129 = vmatpush1.bf16.msra.mxu1 %v3198_v10  ;;  %v3296_v10 = vld [vmem:[%s3540_s9 + $0x2b0] ss:$8 sps:$4 sm:$0xff]  }
  0x33   : > { %1121 = vmatprep.subr.bf16.mxu0 %v3448_v1  ;;  %3120 = vmatprep.subr.bf16.mxu1 %v3448_v1 }
  0x36   : > { %1122 = vmatpush2.bf16.msra.mxu0 %v3199_v11  ;;  %3130 = vmatpush2.bf16.msra.mxu1 %v3199_v11  ;;  %v3297_v11 = vld [vmem:[%s3540_s9 + $0x104] ss:$8 sps:$4 sm:$0xff]  }
  0x37   : > { %1123 = vmatprep.subr.bf16.mxu0 %v3448_v1  ;;  %3121 = vmatprep.subr.bf16.mxu1 %v3448_v1  ;;  %v3283_v1 = vld [vmem:[%s3540_s9 + $0xd0] ss:$8 sps:$4 sm:$0xff]  }
  0x3a   : > { %1124 = vmatpush2.bf16.msra.mxu0 %v3200_v12  ;;  %3131 = vmatpush2.bf16.msra.mxu1 %v3200_v12  ;;  %v3299_v12 = vld [vmem:[%s3540_s9 + $0x2c4] ss:$8 sps:$4 sm:$0xff]  }
  0x3d   : > { %1126 = vmatmul.mubr.bf16.vlgmr.msra.gmra.mxu0 %v3201_v13  ;;  %1350 = vmatmul.mubr.bf16.vlgmr.msra.gmra.mxu1 %v3204_v14  ;;  %v3301_v13 = vld [vmem:[%s3540_s9 + $0x100] ss:$8 sps:$4 sm:$0xff]  }
  0x3e   : > { %2493 = vmatprep.mubr.msk.bf16.mxu0 %vm924_vm0, %v3207_v15  ;;  %2521 = vmatprep.mubr.msk.bf16.mxu1 %vm924_vm0, %v3209_v16  ;;  %v3302_v14 = vld [vmem:[%s3540_s9 + $0x2c0] ss:$8 sps:$4 sm:$0xff]   ;;  %v3303_v15 = vld [vmem:[%s3540_s9 + $0x114] ss:$8 sps:$4 sm:$0xff]  }
  0x3f   : > { %v3305_v16 = vld [vmem:[%s3540_s9 + $0x2d4] ss:$8 sps:$4 sm:$0xff]  }
  0x45   : > { %1134 = vmatmul.mubr.bf16.gmra.mxu0 %v3211_v17  ;;  %1358 = vmatmul.mubr.bf16.gmra.mxu1 %v3212_v18  ;;  %v3307_v17 = vld [vmem:[%s3540_s9 + $0x110] ss:$8 sps:$4 sm:$0xff]  }
  0x46   : > { %2494 = vmatprep.mubr.msk.bf16.mxu0 %vm924_vm0, %v3213_v19  ;;  %2522 = vmatprep.mubr.msk.bf16.mxu1 %vm924_vm0, %v3215_v20  ;;  %v3308_v18 = vld [vmem:[%s3540_s9 + $0x2d0] ss:$8 sps:$4 sm:$0xff]   ;;  %v3309_v19 = vld [vmem:[%s3540_s9 + $0x124] ss:$8 sps:$4 sm:$0xff]  }
  0x47   : > { %v3311_v20 = vld [vmem:[%s3540_s9 + $0x2e4] ss:$8 sps:$4 sm:$0xff]  }
  0x4d   : > { %1142 = vmatmul.mubr.bf16.gmra.mxu0 %v3217_v21  ;;  %1366 = vmatmul.mubr.bf16.gmra.mxu1 %v3218_v22  ;;  %v3313_v21 = vld [vmem:[%s3540_s9 + $0x120] ss:$8 sps:$4 sm:$0xff]  }
  0x4e   : > { %2495 = vmatprep.mubr.msk.bf16.mxu0 %vm924_vm0, %v3219_v23  ;;  %2523 = vmatprep.mubr.msk.bf16.mxu1 %vm924_vm0, %v3221_v24  ;;  %v3314_v22 = vld [vmem:[%s3540_s9 + $0x2e0] ss:$8 sps:$4 sm:$0xff]   ;;  %v3315_v23 = vld [vmem:[%s3540_s9 + $0x134] ss:$8 sps:$4 sm:$0xff]  }
  0x4f   : > { %v3317_v24 = vld [vmem:[%s3540_s9 + $0x2f4] ss:$8 sps:$4 sm:$0xff]  }
  0x55   : > { %1150 = vmatmul.mubr.bf16.gmra.mxu0 %v3223_v25  ;;  %1374 = vmatmul.mubr.bf16.gmra.mxu1 %v3224_v26  ;;  %v3319_v25 = vld [vmem:[%s3540_s9 + $0x130] ss:$8 sps:$4 sm:$0xff]  }
  0x56   : > { %2496 = vmatprep.mubr.msk.bf16.mxu0 %vm924_vm0, %v3225_v27  ;;  %2524 = vmatprep.mubr.msk.bf16.mxu1 %vm924_vm0, %v3227_v28  ;;  %v3320_v26 = vld [vmem:[%s3540_s9 + $0x2f0] ss:$8 sps:$4 sm:$0xff]   ;;  %v3321_v27 = vld [vmem:[%s3540_s9 + $0x144] ss:$8 sps:$4 sm:$0xff]  }
  0x57   : > { %v3323_v28 = vld [vmem:[%s3540_s9 + $0x304] ss:$8 sps:$4 sm:$0xff]  }
  0x5d   : > { %1158 = vmatmul.mubr.bf16.gmra.mxu0 %v3229_v29  ;;  %1382 = vmatmul.mubr.bf16.gmra.mxu1 %v3230_v30  ;;  %v3325_v29 = vld [vmem:[%s3540_s9 + $0x140] ss:$8 sps:$4 sm:$0xff]  }
  0x5e   : > { %2497 = vmatprep.mubr.msk.bf16.mxu0 %vm924_vm0, %v3231_v31  ;;  %2525 = vmatprep.mubr.msk.bf16.mxu1 %vm924_vm0, %v3233_v32  ;;  %v3326_v30 = vld [vmem:[%s3540_s9 + $0x300] ss:$8 sps:$4 sm:$0xff]   ;;  %v3327_v31 = vld [vmem:[%s3540_s9 + $0x154] ss:$8 sps:$4 sm:$0xff]  }
  0x5f   : > { %v3329_v32 = vld [vmem:[%s3540_s9 + $0x314] ss:$8 sps:$4 sm:$0xff]  }
  0x65   : > { %1166 = vmatmul.mubr.bf16.gmra.mxu0 %v3235_v33  ;;  %1390 = vmatmul.mubr.bf16.gmra.mxu1 %v3236_v34  ;;  %v3331_v33 = vld [vmem:[%s3540_s9 + $0x150] ss:$8 sps:$4 sm:$0xff]  }
  0x66   : > { %2498 = vmatprep.mubr.msk.bf16.mxu0 %vm924_vm0, %v3237_v35  ;;  %2526 = vmatprep.mubr.msk.bf16.mxu1 %vm924_vm0, %v3239_v36  ;;  %v3332_v34 = vld [vmem:[%s3540_s9 + $0x310] ss:$8 sps:$4 sm:$0xff]   ;;  %v3333_v35 = vld [vmem:[%s3540_s9 + $0x164] ss:$8 sps:$4 sm:$0xff]  }
  0x67   : > { %v3335_v36 = vld [vmem:[%s3540_s9 + $0x324] ss:$8 sps:$4 sm:$0xff]  }
  0x6d   : > { %1174 = vmatmul.mubr.bf16.gmra.mxu0 %v3241_v37  ;;  %1398 = vmatmul.mubr.bf16.gmra.mxu1 %v3242_v38  ;;  %v3337_v37 = vld [vmem:[%s3540_s9 + $0x160] ss:$8 sps:$4 sm:$0xff]  }
  0x6e   : > { %2499 = vmatprep.mubr.msk.bf16.mxu0 %vm924_vm0, %v3243_v39  ;;  %2527 = vmatprep.mubr.msk.bf16.mxu1 %vm924_vm0, %v3245_v40  ;;  %v3338_v38 = vld [vmem:[%s3540_s9 + $0x320] ss:$8 sps:$4 sm:$0xff]   ;;  %v3339_v39 = vld [vmem:[%s3540_s9 + $0x174] ss:$8 sps:$4 sm:$0xff]  }
  0x6f   : > { %v3341_v40 = vld [vmem:[%s3540_s9 + $0x334] ss:$8 sps:$4 sm:$0xff]  }
  0x75   : > { %1182 = vmatmul.mubr.bf16.gmra.mxu0 %v3247_v41  ;;  %1406 = vmatmul.mubr.bf16.gmra.mxu1 %v3248_v42  ;;  %v3343_v41 = vld [vmem:[%s3540_s9 + $0x170] ss:$8 sps:$4 sm:$0xff]  }
  0x76   : > { %2500 = vmatprep.mubr.msk.bf16.mxu0 %vm924_vm0, %v3249_v43  ;;  %2528 = vmatprep.mubr.msk.bf16.mxu1 %vm924_vm0, %v3251_v44  ;;  %v3344_v42 = vld [vmem:[%s3540_s9 + $0x330] ss:$8 sps:$4 sm:$0xff]   ;;  %v3345_v43 = vld [vmem:[%s3540_s9 + $0x184] ss:$8 sps:$4 sm:$0xff]  }
  0x77   : > { %v3347_v44 = vld [vmem:[%s3540_s9 + $0x344] ss:$8 sps:$4 sm:$0xff]  }
  0x7d   : > { %1190 = vmatmul.mubr.bf16.gmra.mxu0 %v3253_v45  ;;  %1414 = vmatmul.mubr.bf16.gmra.mxu1 %v3254_v46  ;;  %v3349_v45 = vld [vmem:[%s3540_s9 + $0x180] ss:$8 sps:$4 sm:$0xff]  }
  0x7e   : > { %2501 = vmatprep.mubr.msk.bf16.mxu0 %vm924_vm0, %v3255_v47  ;;  %2529 = vmatprep.mubr.msk.bf16.mxu1 %vm924_vm0, %v3257_v48  ;;  %v3350_v46 = vld [vmem:[%s3540_s9 + $0x340] ss:$8 sps:$4 sm:$0xff]   ;;  %v3351_v47 = vld [vmem:[%s3540_s9 + $0x194] ss:$8 sps:$4 sm:$0xff]  }
  0x7f   : > { %v3353_v48 = vld [vmem:[%s3540_s9 + $0x354] ss:$8 sps:$4 sm:$0xff]  }
  0x85   : > { %1198 = vmatmul.mubr.bf16.gmra.mxu0 %v3259_v49  ;;  %1422 = vmatmul.mubr.bf16.gmra.mxu1 %v3260_v50  ;;  %v3718_v49 = vld [vmem:[%s3972_s2] ss:$0 sm:$0xff] }
  0x86   : > { %2502 = vmatprep.mubr.msk.bf16.mxu0 %vm924_vm0, %v3261_v51  ;;  %2530 = vmatprep.mubr.msk.bf16.mxu1 %vm924_vm0, %v3263_v52 }
  0x8d   : > { %1206 = vmatmul.mubr.bf16.gmra.mxu0 %v3265_v53  ;;  %1430 = vmatmul.mubr.bf16.gmra.mxu1 %v3266_v54 }
  0x8e   : > { %2503 = vmatprep.mubr.msk.bf16.mxu0 %vm924_vm0, %v3267_v55  ;;  %2531 = vmatprep.mubr.msk.bf16.mxu1 %vm924_vm0, %v3269_v56 }
  0x95   : > { %1214 = vmatmul.mubr.bf16.gmra.mxu0 %v3271_v57  ;;  %1438 = vmatmul.mubr.bf16.gmra.mxu1 %v3272_v58  ;;  %v3355_v58 = vld [vmem:[%s3540_s9 + $0x190] ss:$8 sps:$4 sm:$0xff]  }
  0x96   : > { %2504 = vmatprep.mubr.msk.bf16.mxu0 %vm924_vm0, %v3273_v59  ;;  %2532 = vmatprep.mubr.msk.bf16.mxu1 %vm924_vm0, %v3275_v60  ;;  %v3356_v59 = vld [vmem:[%s3540_s9 + $0x350] ss:$8 sps:$4 sm:$0xff]  }
  0x9d   : > { %1222 = vmatmul.mubr.bf16.gmra.mxu0 %v3277_v61  ;;  %1446 = vmatmul.mubr.bf16.gmra.mxu1 %v3278_v62  ;;  %v3357_v62 = vld [vmem:[%s3540_s9 + $0x1a4] ss:$8 sps:$4 sm:$0xff]  }
  0x9e   : > { %2505 = vmatprep.mubr.msk.bf16.mxu0 %vm924_vm0, %v3279_v63  ;;  %2533 = vmatprep.mubr.msk.bf16.mxu1 %vm924_vm0, %v3281_v0 }
  0xa5   : > { %1230 = vmatmul.mubr.bf16.gmra.mxu0 %v3283_v1  ;;  %1454 = vmatmul.mubr.bf16.gmra.mxu1 %v3284_v2  ;;  %v3359_v1 = vld [vmem:[%s3540_s9 + $0x364] ss:$8 sps:$4 sm:$0xff]  }
  0xa6   : > { %2506 = vmatprep.mubr.msk.bf16.mxu0 %vm924_vm0, %v3285_v3  ;;  %2534 = vmatprep.mubr.msk.bf16.mxu1 %vm924_vm0, %v3287_v4 }
  0xad   : > { %1238 = vmatmul.mubr.bf16.gmra.mxu0 %v3289_v5  ;;  %1462 = vmatmul.mubr.bf16.gmra.mxu1 %v3290_v6 }
  0xae   : > { %2507 = vmatprep.mubr.msk.bf16.mxu0 %vm924_vm0, %v3291_v7  ;;  %2535 = vmatprep.mubr.msk.bf16.mxu1 %vm924_vm0, %v3293_v8 }
  0xb5   : > { %1246 = vmatmul.mubr.bf16.gmra.mxu0 %v3295_v9  ;;  %1470 = vmatmul.mubr.bf16.gmra.mxu1 %v3296_v10 }
  0xb6   : > { %2508 = vmatprep.mubr.msk.bf16.mxu0 %vm924_vm0, %v3297_v11  ;;  %2536 = vmatprep.mubr.msk.bf16.mxu1 %vm924_vm0, %v3299_v12 }
  0xbd   : > { %1254 = vmatmul.mubr.bf16.gmra.mxu0 %v3301_v13  ;;  %1478 = vmatmul.mubr.bf16.gmra.mxu1 %v3302_v14 }
  0xbe   : > { %2509 = vmatprep.mubr.msk.bf16.mxu0 %vm924_vm0, %v3303_v15  ;;  %2537 = vmatprep.mubr.msk.bf16.mxu1 %vm924_vm0, %v3305_v16  ;;  %v3361_v16 = vld [vmem:[%s3540_s9 + $0x1a0] ss:$8 sps:$4 sm:$0xff]  }
  0xc5   : > { %1262 = vmatmul.mubr.bf16.gmra.mxu0 %v3307_v17  ;;  %1486 = vmatmul.mubr.bf16.gmra.mxu1 %v3308_v18  ;;  %v3362_v17 = vld [vmem:[%s3540_s9 + $0x360] ss:$8 sps:$4 sm:$0xff]  }
  0xc6   : > { %2510 = vmatprep.mubr.msk.bf16.mxu0 %vm924_vm0, %v3309_v19  ;;  %2538 = vmatprep.mubr.msk.bf16.mxu1 %vm924_vm0, %v3311_v20  ;;  %v3363_v20 = vld [vmem:[%s3540_s9 + $0x1b4] ss:$8 sps:$4 sm:$0xff]  }
  0xcd   : > { %1270 = vmatmul.mubr.bf16.gmra.mxu0 %v3313_v21  ;;  %1494 = vmatmul.mubr.bf16.gmra.mxu1 %v3314_v22 }
  0xce   : > { %2511 = vmatprep.mubr.msk.bf16.mxu0 %vm924_vm0, %v3315_v23  ;;  %2539 = vmatprep.mubr.msk.bf16.mxu1 %vm924_vm0, %v3317_v24  ;;  %v3365_v23 = vld [vmem:[%s3540_s9 + $0x374] ss:$8 sps:$4 sm:$0xff]  }
  0xd5   : > { %1278 = vmatmul.mubr.bf16.gmra.mxu0 %v3319_v25  ;;  %1502 = vmatmul.mubr.bf16.gmra.mxu1 %v3320_v26 }
  0xd6   : > { %2512 = vmatprep.mubr.msk.bf16.mxu0 %vm924_vm0, %v3321_v27  ;;  %2540 = vmatprep.mubr.msk.bf16.mxu1 %vm924_vm0, %v3323_v28 }
  0xdd   : > { %1286 = vmatmul.mubr.bf16.gmra.mxu0 %v3325_v29  ;;  %1510 = vmatmul.mubr.bf16.gmra.mxu1 %v3326_v30 }
  0xde   : > { %2513 = vmatprep.mubr.msk.bf16.mxu0 %vm924_vm0, %v3327_v31  ;;  %2541 = vmatprep.mubr.msk.bf16.mxu1 %vm924_vm0, %v3329_v32 }
  0xe5   : > { %1294 = vmatmul.mubr.bf16.gmra.mxu0 %v3331_v33  ;;  %1518 = vmatmul.mubr.bf16.gmra.mxu1 %v3332_v34 }
  0xe6   : > { %2514 = vmatprep.mubr.msk.bf16.mxu0 %vm924_vm0, %v3333_v35  ;;  %2542 = vmatprep.mubr.msk.bf16.mxu1 %vm924_vm0, %v3335_v36 }
  0xed   : > { %1302 = vmatmul.mubr.bf16.gmra.mxu0 %v3337_v37  ;;  %1526 = vmatmul.mubr.bf16.gmra.mxu1 %v3338_v38  ;;  %v3367_v38 = vld [vmem:[%s3540_s9 + $0x1b0] ss:$8 sps:$4 sm:$0xff]  }
  0xee   : > { %2515 = vmatprep.mubr.msk.bf16.mxu0 %vm924_vm0, %v3339_v39  ;;  %2543 = vmatprep.mubr.msk.bf16.mxu1 %vm924_vm0, %v3341_v40  ;;  %v3368_v39 = vld [vmem:[%s3540_s9 + $0x370] ss:$8 sps:$4 sm:$0xff]  }
  0xf5   : > { %1310 = vmatmul.mubr.bf16.gmra.mxu0 %v3343_v41  ;;  %1534 = vmatmul.mubr.bf16.gmra.mxu1 %v3344_v42 }
  0xf6   : > { %2516 = vmatprep.mubr.msk.bf16.mxu0 %vm924_vm0, %v3345_v43  ;;  %2544 = vmatprep.mubr.msk.bf16.mxu1 %vm924_vm0, %v3347_v44 }
  0xfd   : > { %v1127_v50 = vpop.f32.mrf.mxu0  ;;  %1318 = vmatmul.mubr.bf16.gmra.mxu0 %v3349_v45  ;;  %v1351_v51 = vpop.f32.mrf.mxu1  ;;  %1542 = vmatmul.mubr.bf16.gmra.mxu1 %v3350_v46 }
  0xfe   : > { %2517 = vmatprep.mubr.msk.bf16.mxu0 %vm924_vm0, %v3351_v47  ;;  %2545 = vmatprep.mubr.msk.bf16.mxu1 %vm924_vm0, %v3353_v48  ;;  %v1128_v54 = vadd.f32 %v3718_v49, %v1127_v50  ;;  %v1352_v55 = vadd.f32 %v3718_v49, %v1351_v51 }
  0xff   : > { %v1129_v52 = vpop.f32.mrf.mxu0  ;;  %v1353_v53 = vpop.f32.mrf.mxu1 }
 0x100   : > { %v1574_v2 = vmax.f32 %v1128_v54, 0.0  ;;  %v1630_v3 = vmax.f32 %v1352_v55, 0.0 }
 0x101   : > { %v1130_v56 = vpop.f32.mrf.mxu0  ;;  %v1354_v57 = vpop.f32.mrf.mxu1 }
 0x102   : > { %v1131_v60 = vadd.f32 %v3718_v49, %v1130_v56  ;;  %v1355_v61 = vadd.f32 %v3718_v49, %v1354_v57 }
 0x103   : > { %v1132_v63 = vpop.f32.mrf.mxu0  ;;  %v1356_v0 = vpop.f32.mrf.mxu1 }
 0x104   : > { %v1575_v4 = vmax.f32 %v1131_v60, 0.0  ;;  %v1631_v5 = vmax.f32 %v1355_v61, 0.0 }
 0x105   : > { %v1135_v6 = vpop.f32.mrf.mxu0  ;;  %1326 = vmatmul.mubr.bf16.gmra.mxu0 %v3355_v58  ;;  %v1359_v7 = vpop.f32.mrf.mxu1  ;;  %1550 = vmatmul.mubr.bf16.gmra.mxu1 %v3356_v59 }
 0x106   : > { %v2780_v8 = vpack.c.bf16 %v1575_v4, %v1574_v2  ;;  %v2920_v9 = vpack.c.bf16 %v1631_v5, %v1630_v3  ;;  %2518 = vmatprep.mubr.msk.bf16.mxu0 %vm924_vm0, %v3357_v62  ;;  %2546 = vmatprep.mubr.msk.bf16.mxu1 %vm924_vm0, %v3359_v1  ;;  %v1136_v12 = vadd.f32 %v3718_v49, %v1135_v6 }
 0x107   : > { %v1137_v10 = vpop.f32.mrf.mxu0  ;;  %v1361_v11 = vpop.f32.mrf.mxu1  ;;  %v1360_v13 = vadd.f32 %v3718_v49, %v1359_v7 }
 0x108   : > { %2781 = vst [vmem:[%s3735_s18] sm:$0xff] %v2780_v8   ;;  %3084 = vst [vmem:[%s3735_s18 + $0xe0] sm:$0xff] %v2920_v9   ;;  %v1576_v24 = vmax.f32 %v1136_v12, 0.0 }
 0x109   : > { %v1138_v14 = vpop.f32.mrf.mxu0  ;;  %v1362_v15 = vpop.f32.mrf.mxu1  ;;  %v1632_v25 = vmax.f32 %v1360_v13, 0.0 }
 0x10a   : > { %v1139_v18 = vadd.f32 %v3718_v49, %v1138_v14  ;;  %v1363_v19 = vadd.f32 %v3718_v49, %v1362_v15 }
 0x10b   : > { %v1140_v21 = vpop.f32.mrf.mxu0  ;;  %v1364_v22 = vpop.f32.mrf.mxu1 }
 0x10c   : > { %v1577_v26 = vmax.f32 %v1139_v18, 0.0  ;;  %v1633_v27 = vmax.f32 %v1363_v19, 0.0 }
 0x10d   : > { %v1143_v28 = vpop.f32.mrf.mxu0  ;;  %1334 = vmatmul.mubr.bf16.gmra.mxu0 %v3361_v16  ;;  %v1367_v29 = vpop.f32.mrf.mxu1  ;;  %1558 = vmatmul.mubr.bf16.gmra.mxu1 %v3362_v17 }
 0x10e   : > { %v2785_v30 = vpack.c.bf16 %v1577_v26, %v1576_v24  ;;  %v2925_v31 = vpack.c.bf16 %v1633_v27, %v1632_v25  ;;  %2519 = vmatprep.mubr.msk.bf16.mxu0 %vm924_vm0, %v3363_v20  ;;  %2547 = vmatprep.mubr.msk.bf16.mxu1 %vm924_vm0, %v3365_v23  ;;  %v1144_v34 = vadd.f32 %v3718_v49, %v1143_v28 }
 0x10f   : > { %v1145_v32 = vpop.f32.mrf.mxu0  ;;  %v1369_v33 = vpop.f32.mrf.mxu1  ;;  %v1368_v35 = vadd.f32 %v3718_v49, %v1367_v29 }
 0x110   : > { %3057 = vst [vmem:[%s3735_s18 + $0x8] sm:$0xff] %v2785_v30   ;;  %3085 = vst [vmem:[%s3735_s18 + $0xe8] sm:$0xff] %v2925_v31   ;;  %v1578_v44 = vmax.f32 %v1144_v34, 0.0 }
 0x111   : > { %v1146_v36 = vpop.f32.mrf.mxu0  ;;  %v1370_v37 = vpop.f32.mrf.mxu1  ;;  %v1634_v45 = vmax.f32 %v1368_v35, 0.0 }
 0x112   : > { %v1147_v40 = vadd.f32 %v3718_v49, %v1146_v36  ;;  %v1371_v41 = vadd.f32 %v3718_v49, %v1370_v37 }
 0x113   : > { %v1148_v42 = vpop.f32.mrf.mxu0  ;;  %v1372_v43 = vpop.f32.mrf.mxu1 }
 0x114   : > { %v1579_v46 = vmax.f32 %v1147_v40, 0.0  ;;  %v1635_v47 = vmax.f32 %v1371_v41, 0.0 }
 0x115   : > { %v1151_v48 = vpop.f32.mrf.mxu0  ;;  %1342 = vmatmul.mubr.bf16.gmra.mxu0 %v3367_v38  ;;  %v1375_v50 = vpop.f32.mrf.mxu1  ;;  %1566 = vmatmul.mubr.bf16.gmra.mxu1 %v3368_v39 }
 0x116   : > { %v2790_v51 = vpack.c.bf16 %v1579_v46, %v1578_v44  ;;  %v2930_v52 = vpack.c.bf16 %v1635_v47, %v1634_v45  ;;  %v1152_v55 = vadd.f32 %v3718_v49, %v1151_v48  ;;  %v1376_v56 = vadd.f32 %v3718_v49, %v1375_v50 }
 0x117   : > { %v1153_v53 = vpop.f32.mrf.mxu0  ;;  %v1377_v54 = vpop.f32.mrf.mxu1 }
 0x118   : > { %3058 = vst [vmem:[%s3735_s18 + $0x10] sm:$0xff] %v2790_v51   ;;  %3086 = vst [vmem:[%s3735_s18 + $0xf0] sm:$0xff] %v2930_v52   ;;  %v1580_v63 = vmax.f32 %v1152_v55, 0.0  ;;  %v1636_v0 = vmax.f32 %v1376_v56, 0.0 }
 0x119   : > { %v1154_v57 = vpop.f32.mrf.mxu0  ;;  %v1378_v58 = vpop.f32.mrf.mxu1 }
 0x11a   : > { %v1155_v59 = vadd.f32 %v3718_v49, %v1154_v57  ;;  %v1379_v60 = vadd.f32 %v3718_v49, %v1378_v58 }
 0x11b   : > { %v1156_v61 = vpop.f32.mrf.mxu0  ;;  %v1380_v62 = vpop.f32.mrf.mxu1 }
 0x11c   : > { %v1581_v1 = vmax.f32 %v1155_v59, 0.0  ;;  %v1637_v2 = vmax.f32 %v1379_v60, 0.0 }
 0x11d   : > { %v1159_v3 = vpop.f32.mrf.mxu0  ;;  %v1383_v4 = vpop.f32.mrf.mxu1 }
 0x11e   : > { %v2795_v5 = vpack.c.bf16 %v1581_v1, %v1580_v63  ;;  %v2935_v6 = vpack.c.bf16 %v1637_v2, %v1636_v0  ;;  %v1160_v9 = vadd.f32 %v3718_v49, %v1159_v3  ;;  %v1384_v10 = vadd.f32 %v3718_v49, %v1383_v4 }
 0x11f   : > { %v1161_v7 = vpop.f32.mrf.mxu0  ;;  %v1385_v8 = vpop.f32.mrf.mxu1 }
 0x120   : > { %3059 = vst [vmem:[%s3735_s18 + $0x18] sm:$0xff] %v2795_v5   ;;  %3087 = vst [vmem:[%s3735_s18 + $0xf8] sm:$0xff] %v2935_v6   ;;  %v1582_v17 = vmax.f32 %v1160_v9, 0.0  ;;  %v1638_v18 = vmax.f32 %v1384_v10, 0.0 }
 0x121   : > { %v1162_v11 = vpop.f32.mrf.mxu0  ;;  %v1386_v12 = vpop.f32.mrf.mxu1 }
 0x122   : > { %v1163_v13 = vadd.f32 %v3718_v49, %v1162_v11  ;;  %v1387_v14 = vadd.f32 %v3718_v49, %v1386_v12 }
 0x123   : > { %v1164_v15 = vpop.f32.mrf.mxu0  ;;  %v1388_v16 = vpop.f32.mrf.mxu1 }
 0x124   : > { %v1583_v19 = vmax.f32 %v1163_v13, 0.0  ;;  %v1639_v20 = vmax.f32 %v1387_v14, 0.0 }
 0x125   : > { %v1167_v21 = vpop.f32.mrf.mxu0  ;;  %v1391_v22 = vpop.f32.mrf.mxu1 }
 0x126   : > { %v2800_v23 = vpack.c.bf16 %v1583_v19, %v1582_v17  ;;  %v2940_v24 = vpack.c.bf16 %v1639_v20, %v1638_v18  ;;  %v1168_v27 = vadd.f32 %v3718_v49, %v1167_v21  ;;  %v1392_v28 = vadd.f32 %v3718_v49, %v1391_v22 }
 0x127   : > { %v1169_v25 = vpop.f32.mrf.mxu0  ;;  %v1393_v26 = vpop.f32.mrf.mxu1 }
 0x128   : > { %3060 = vst [vmem:[%s3735_s18 + $0x20] sm:$0xff] %v2800_v23   ;;  %3088 = vst [vmem:[%s3735_s18 + $0x100] sm:$0xff] %v2940_v24   ;;  %v1584_v35 = vmax.f32 %v1168_v27, 0.0  ;;  %v1640_v36 = vmax.f32 %v1392_v28, 0.0 }
 0x129   : > { %v1170_v29 = vpop.f32.mrf.mxu0  ;;  %v1394_v30 = vpop.f32.mrf.mxu1 }
 0x12a   : > { %v1171_v31 = vadd.f32 %v3718_v49, %v1170_v29  ;;  %v1395_v32 = vadd.f32 %v3718_v49, %v1394_v30 }
 0x12b   : > { %v1172_v33 = vpop.f32.mrf.mxu0  ;;  %v1396_v34 = vpop.f32.mrf.mxu1 }
 0x12c   : > { %v1585_v37 = vmax.f32 %v1171_v31, 0.0  ;;  %v1641_v38 = vmax.f32 %v1395_v32, 0.0 }
 0x12d   : > { %v1175_v39 = vpop.f32.mrf.mxu0  ;;  %v1399_v40 = vpop.f32.mrf.mxu1 }
 0x12e   : > { %v2805_v41 = vpack.c.bf16 %v1585_v37, %v1584_v35  ;;  %v2945_v42 = vpack.c.bf16 %v1641_v38, %v1640_v36  ;;  %v1176_v45 = vadd.f32 %v3718_v49, %v1175_v39  ;;  %v1400_v46 = vadd.f32 %v3718_v49, %v1399_v40 }
 0x12f   : > { %v1177_v43 = vpop.f32.mrf.mxu0  ;;  %v1401_v44 = vpop.f32.mrf.mxu1 }
 0x130   : > { %3061 = vst [vmem:[%s3735_s18 + $0x28] sm:$0xff] %v2805_v41   ;;  %3089 = vst [vmem:[%s3735_s18 + $0x108] sm:$0xff] %v2945_v42   ;;  %v1586_v54 = vmax.f32 %v1176_v45, 0.0  ;;  %v1642_v55 = vmax.f32 %v1400_v46, 0.0 }
 0x131   : > { %v1178_v47 = vpop.f32.mrf.mxu0  ;;  %v1402_v48 = vpop.f32.mrf.mxu1 }
 0x132   : > { %v1179_v50 = vadd.f32 %v3718_v49, %v1178_v47  ;;  %v1403_v51 = vadd.f32 %v3718_v49, %v1402_v48 }
 0x133   : > { %v1180_v52 = vpop.f32.mrf.mxu0  ;;  %v1404_v53 = vpop.f32.mrf.mxu1 }
 0x134   : > { %v1587_v56 = vmax.f32 %v1179_v50, 0.0  ;;  %v1643_v57 = vmax.f32 %v1403_v51, 0.0 }
 0x135   : > { %v1183_v58 = vpop.f32.mrf.mxu0  ;;  %v1407_v59 = vpop.f32.mrf.mxu1 }
 0x136   : > { %v2810_v60 = vpack.c.bf16 %v1587_v56, %v1586_v54  ;;  %v2950_v61 = vpack.c.bf16 %v1643_v57, %v1642_v55  ;;  %v1184_v0 = vadd.f32 %v3718_v49, %v1183_v58  ;;  %v1408_v1 = vadd.f32 %v3718_v49, %v1407_v59 }
 0x137   : > { %v1185_v62 = vpop.f32.mrf.mxu0  ;;  %v1409_v63 = vpop.f32.mrf.mxu1 }
 0x138   : > { %3062 = vst [vmem:[%s3735_s18 + $0x30] sm:$0xff] %v2810_v60   ;;  %3090 = vst [vmem:[%s3735_s18 + $0x110] sm:$0xff] %v2950_v61   ;;  %v1588_v8 = vmax.f32 %v1184_v0, 0.0  ;;  %v1644_v9 = vmax.f32 %v1408_v1, 0.0 }
 0x139   : > { %v1186_v2 = vpop.f32.mrf.mxu0  ;;  %v1410_v3 = vpop.f32.mrf.mxu1 }
 0x13a   : > { %v1187_v4 = vadd.f32 %v3718_v49, %v1186_v2  ;;  %v1411_v5 = vadd.f32 %v3718_v49, %v1410_v3 }
 0x13b   : > { %v1188_v6 = vpop.f32.mrf.mxu0  ;;  %v1412_v7 = vpop.f32.mrf.mxu1 }
 0x13c   : > { %v1589_v10 = vmax.f32 %v1187_v4, 0.0  ;;  %v1645_v11 = vmax.f32 %v1411_v5, 0.0 }
 0x13d   : > { %v1191_v12 = vpop.f32.mrf.mxu0  ;;  %v1415_v13 = vpop.f32.mrf.mxu1 }
 0x13e   : > { %v2815_v14 = vpack.c.bf16 %v1589_v10, %v1588_v8  ;;  %v2955_v15 = vpack.c.bf16 %v1645_v11, %v1644_v9  ;;  %v1192_v18 = vadd.f32 %v3718_v49, %v1191_v12  ;;  %v1416_v19 = vadd.f32 %v3718_v49, %v1415_v13 }
 0x13f   : > { %v1193_v16 = vpop.f32.mrf.mxu0  ;;  %v1417_v17 = vpop.f32.mrf.mxu1 }
 0x140   : > { %3063 = vst [vmem:[%s3735_s18 + $0x38] sm:$0xff] %v2815_v14   ;;  %3091 = vst [vmem:[%s3735_s18 + $0x118] sm:$0xff] %v2955_v15   ;;  %v1590_v26 = vmax.f32 %v1192_v18, 0.0  ;;  %v1646_v27 = vmax.f32 %v1416_v19, 0.0 }
 0x141   : > { %v1194_v20 = vpop.f32.mrf.mxu0  ;;  %v1418_v21 = vpop.f32.mrf.mxu1 }
 0x142   : > { %v1195_v22 = vadd.f32 %v3718_v49, %v1194_v20  ;;  %v1419_v23 = vadd.f32 %v3718_v49, %v1418_v21 }
 0x143   : > { %v1196_v24 = vpop.f32.mrf.mxu0  ;;  %v1420_v25 = vpop.f32.mrf.mxu1 }
 0x144   : > { %v1591_v28 = vmax.f32 %v1195_v22, 0.0  ;;  %v1647_v29 = vmax.f32 %v1419_v23, 0.0 }
 0x145   : > { %v1199_v30 = vpop.f32.mrf.mxu0  ;;  %v1423_v31 = vpop.f32.mrf.mxu1 }
 0x146   : > { %v2820_v32 = vpack.c.bf16 %v1591_v28, %v1590_v26  ;;  %v2960_v33 = vpack.c.bf16 %v1647_v29, %v1646_v27  ;;  %v1200_v36 = vadd.f32 %v3718_v49, %v1199_v30  ;;  %v1424_v37 = vadd.f32 %v3718_v49, %v1423_v31 }
 0x147   : > { %v1201_v34 = vpop.f32.mrf.mxu0  ;;  %v1425_v35 = vpop.f32.mrf.mxu1 }
 0x148   : > { %3064 = vst [vmem:[%s3735_s18 + $0x40] sm:$0xff] %v2820_v32   ;;  %3092 = vst [vmem:[%s3735_s18 + $0x120] sm:$0xff] %v2960_v33   ;;  %v1592_v44 = vmax.f32 %v1200_v36, 0.0  ;;  %v1648_v45 = vmax.f32 %v1424_v37, 0.0 }
 0x149   : > { %v1202_v38 = vpop.f32.mrf.mxu0  ;;  %v1426_v39 = vpop.f32.mrf.mxu1 }
 0x14a   : > { %v1203_v40 = vadd.f32 %v3718_v49, %v1202_v38  ;;  %v1427_v41 = vadd.f32 %v3718_v49, %v1426_v39 }
 0x14b   : > { %v1204_v42 = vpop.f32.mrf.mxu0  ;;  %v1428_v43 = vpop.f32.mrf.mxu1 }
 0x14c   : > { %v1593_v46 = vmax.f32 %v1203_v40, 0.0  ;;  %v1649_v47 = vmax.f32 %v1427_v41, 0.0 }
 0x14d   : > { %v1207_v48 = vpop.f32.mrf.mxu0  ;;  %v1431_v50 = vpop.f32.mrf.mxu1 }
 0x14e   : > { %v2825_v51 = vpack.c.bf16 %v1593_v46, %v1592_v44  ;;  %v2965_v52 = vpack.c.bf16 %v1649_v47, %v1648_v45  ;;  %v1208_v55 = vadd.f32 %v3718_v49, %v1207_v48  ;;  %v1432_v56 = vadd.f32 %v3718_v49, %v1431_v50 }
 0x14f   : > { %v1209_v53 = vpop.f32.mrf.mxu0  ;;  %v1433_v54 = vpop.f32.mrf.mxu1 }
 0x150   : > { %3065 = vst [vmem:[%s3735_s18 + $0x48] sm:$0xff] %v2825_v51   ;;  %3093 = vst [vmem:[%s3735_s18 + $0x128] sm:$0xff] %v2965_v52   ;;  %v1594_v63 = vmax.f32 %v1208_v55, 0.0  ;;  %v1650_v0 = vmax.f32 %v1432_v56, 0.0 }
 0x151   : > { %v1210_v57 = vpop.f32.mrf.mxu0  ;;  %v1434_v58 = vpop.f32.mrf.mxu1 }
 0x152   : > { %v1211_v59 = vadd.f32 %v3718_v49, %v1210_v57  ;;  %v1435_v60 = vadd.f32 %v3718_v49, %v1434_v58 }
 0x153   : > { %v1212_v61 = vpop.f32.mrf.mxu0  ;;  %v1436_v62 = vpop.f32.mrf.mxu1 }
 0x154   : > { %v1595_v1 = vmax.f32 %v1211_v59, 0.0  ;;  %v1651_v2 = vmax.f32 %v1435_v60, 0.0 }
 0x155   : > { %v1215_v3 = vpop.f32.mrf.mxu0  ;;  %v1439_v4 = vpop.f32.mrf.mxu1 }
 0x156   : > { %v2830_v5 = vpack.c.bf16 %v1595_v1, %v1594_v63  ;;  %v2970_v6 = vpack.c.bf16 %v1651_v2, %v1650_v0  ;;  %v1216_v9 = vadd.f32 %v3718_v49, %v1215_v3  ;;  %v1440_v10 = vadd.f32 %v3718_v49, %v1439_v4 }
 0x157   : > { %v1217_v7 = vpop.f32.mrf.mxu0  ;;  %v1441_v8 = vpop.f32.mrf.mxu1 }
 0x158   : > { %3066 = vst [vmem:[%s3735_s18 + $0x50] sm:$0xff] %v2830_v5   ;;  %3094 = vst [vmem:[%s3735_s18 + $0x130] sm:$0xff] %v2970_v6   ;;  %v1596_v17 = vmax.f32 %v1216_v9, 0.0  ;;  %v1652_v18 = vmax.f32 %v1440_v10, 0.0 }
 0x159   : > { %v1218_v11 = vpop.f32.mrf.mxu0  ;;  %v1442_v12 = vpop.f32.mrf.mxu1 }
 0x15a   : > { %v1219_v13 = vadd.f32 %v3718_v49, %v1218_v11  ;;  %v1443_v14 = vadd.f32 %v3718_v49, %v1442_v12 }
 0x15b   : > { %v1220_v15 = vpop.f32.mrf.mxu0  ;;  %v1444_v16 = vpop.f32.mrf.mxu1 }
 0x15c   : > { %v1597_v19 = vmax.f32 %v1219_v13, 0.0  ;;  %v1653_v20 = vmax.f32 %v1443_v14, 0.0 }
 0x15d   : > { %v1223_v21 = vpop.f32.mrf.mxu0  ;;  %v1447_v22 = vpop.f32.mrf.mxu1 }
 0x15e   : > { %v2835_v23 = vpack.c.bf16 %v1597_v19, %v1596_v17  ;;  %v2975_v24 = vpack.c.bf16 %v1653_v20, %v1652_v18  ;;  %v1224_v27 = vadd.f32 %v3718_v49, %v1223_v21  ;;  %v1448_v28 = vadd.f32 %v3718_v49, %v1447_v22 }
 0x15f   : > { %v1225_v25 = vpop.f32.mrf.mxu0  ;;  %v1449_v26 = vpop.f32.mrf.mxu1 }
 0x160   : > { %3067 = vst [vmem:[%s3735_s18 + $0x58] sm:$0xff] %v2835_v23   ;;  %3095 = vst [vmem:[%s3735_s18 + $0x138] sm:$0xff] %v2975_v24   ;;  %v1598_v35 = vmax.f32 %v1224_v27, 0.0  ;;  %v1654_v36 = vmax.f32 %v1448_v28, 0.0 }
 0x161   : > { %v1226_v29 = vpop.f32.mrf.mxu0  ;;  %v1450_v30 = vpop.f32.mrf.mxu1 }
 0x162   : > { %v1227_v31 = vadd.f32 %v3718_v49, %v1226_v29  ;;  %v1451_v32 = vadd.f32 %v3718_v49, %v1450_v30 }
 0x163   : > { %v1228_v33 = vpop.f32.mrf.mxu0  ;;  %v1452_v34 = vpop.f32.mrf.mxu1 }
 0x164   : > { %v1599_v37 = vmax.f32 %v1227_v31, 0.0  ;;  %v1655_v38 = vmax.f32 %v1451_v32, 0.0 }
 0x165   : > { %v1231_v39 = vpop.f32.mrf.mxu0  ;;  %v1455_v40 = vpop.f32.mrf.mxu1 }
 0x166   : > { %v2840_v41 = vpack.c.bf16 %v1599_v37, %v1598_v35  ;;  %v2980_v42 = vpack.c.bf16 %v1655_v38, %v1654_v36  ;;  %v1232_v45 = vadd.f32 %v3718_v49, %v1231_v39  ;;  %v1456_v46 = vadd.f32 %v3718_v49, %v1455_v40 }
 0x167   : > { %v1233_v43 = vpop.f32.mrf.mxu0  ;;  %v1457_v44 = vpop.f32.mrf.mxu1 }
 0x168   : > { %3068 = vst [vmem:[%s3735_s18 + $0x60] sm:$0xff] %v2840_v41   ;;  %3096 = vst [vmem:[%s3735_s18 + $0x140] sm:$0xff] %v2980_v42   ;;  %v1600_v54 = vmax.f32 %v1232_v45, 0.0  ;;  %v1656_v55 = vmax.f32 %v1456_v46, 0.0 }
 0x169   : > { %v1234_v47 = vpop.f32.mrf.mxu0  ;;  %v1458_v48 = vpop.f32.mrf.mxu1 }
 0x16a   : > { %v1235_v50 = vadd.f32 %v3718_v49, %v1234_v47  ;;  %v1459_v51 = vadd.f32 %v3718_v49, %v1458_v48 }
 0x16b   : > { %v1236_v52 = vpop.f32.mrf.mxu0  ;;  %v1460_v53 = vpop.f32.mrf.mxu1 }
 0x16c   : > { %v1601_v56 = vmax.f32 %v1235_v50, 0.0  ;;  %v1657_v57 = vmax.f32 %v1459_v51, 0.0 }
 0x16d   : > { %v1239_v58 = vpop.f32.mrf.mxu0  ;;  %v1463_v59 = vpop.f32.mrf.mxu1 }
 0x16e   : > { %v2845_v60 = vpack.c.bf16 %v1601_v56, %v1600_v54  ;;  %v2985_v61 = vpack.c.bf16 %v1657_v57, %v1656_v55  ;;  %v1240_v0 = vadd.f32 %v3718_v49, %v1239_v58  ;;  %v1464_v1 = vadd.f32 %v3718_v49, %v1463_v59 }
 0x16f   : > { %v1241_v62 = vpop.f32.mrf.mxu0  ;;  %v1465_v63 = vpop.f32.mrf.mxu1 }
 0x170   : > { %3069 = vst [vmem:[%s3735_s18 + $0x68] sm:$0xff] %v2845_v60   ;;  %3097 = vst [vmem:[%s3735_s18 + $0x148] sm:$0xff] %v2985_v61   ;;  %v1602_v8 = vmax.f32 %v1240_v0, 0.0  ;;  %v1658_v9 = vmax.f32 %v1464_v1, 0.0 }
 0x171   : > { %v1242_v2 = vpop.f32.mrf.mxu0  ;;  %v1466_v3 = vpop.f32.mrf.mxu1 }
 0x172   : > { %v1243_v4 = vadd.f32 %v3718_v49, %v1242_v2  ;;  %v1467_v5 = vadd.f32 %v3718_v49, %v1466_v3 }
 0x173   : > { %v1244_v6 = vpop.f32.mrf.mxu0  ;;  %v1468_v7 = vpop.f32.mrf.mxu1 }
 0x174   : > { %v1603_v10 = vmax.f32 %v1243_v4, 0.0  ;;  %v1659_v11 = vmax.f32 %v1467_v5, 0.0 }
 0x175   : > { %v1247_v12 = vpop.f32.mrf.mxu0  ;;  %v1471_v13 = vpop.f32.mrf.mxu1 }
 0x176   : > { %v2850_v14 = vpack.c.bf16 %v1603_v10, %v1602_v8  ;;  %v2990_v15 = vpack.c.bf16 %v1659_v11, %v1658_v9  ;;  %v1248_v18 = vadd.f32 %v3718_v49, %v1247_v12  ;;  %v1472_v19 = vadd.f32 %v3718_v49, %v1471_v13 }
 0x177   : > { %v1249_v16 = vpop.f32.mrf.mxu0  ;;  %v1473_v17 = vpop.f32.mrf.mxu1 }
 0x178   : > { %3070 = vst [vmem:[%s3735_s18 + $0x70] sm:$0xff] %v2850_v14   ;;  %3098 = vst [vmem:[%s3735_s18 + $0x150] sm:$0xff] %v2990_v15   ;;  %v1604_v26 = vmax.f32 %v1248_v18, 0.0  ;;  %v1660_v27 = vmax.f32 %v1472_v19, 0.0 }
 0x179   : > { %v1250_v20 = vpop.f32.mrf.mxu0  ;;  %v1474_v21 = vpop.f32.mrf.mxu1 }
 0x17a   : > { %v1251_v22 = vadd.f32 %v3718_v49, %v1250_v20  ;;  %v1475_v23 = vadd.f32 %v3718_v49, %v1474_v21 }
 0x17b   : > { %v1252_v24 = vpop.f32.mrf.mxu0  ;;  %v1476_v25 = vpop.f32.mrf.mxu1 }
 0x17c   : > { %v1605_v28 = vmax.f32 %v1251_v22, 0.0  ;;  %v1661_v29 = vmax.f32 %v1475_v23, 0.0 }
 0x17d   : > { %v1255_v30 = vpop.f32.mrf.mxu0  ;;  %v1479_v31 = vpop.f32.mrf.mxu1 }
 0x17e   : > { %v2855_v32 = vpack.c.bf16 %v1605_v28, %v1604_v26  ;;  %v2995_v33 = vpack.c.bf16 %v1661_v29, %v1660_v27  ;;  %v1256_v36 = vadd.f32 %v3718_v49, %v1255_v30  ;;  %v1480_v37 = vadd.f32 %v3718_v49, %v1479_v31 }
 0x17f   : > { %v1257_v34 = vpop.f32.mrf.mxu0  ;;  %v1481_v35 = vpop.f32.mrf.mxu1 }
 0x180   : > { %3071 = vst [vmem:[%s3735_s18 + $0x78] sm:$0xff] %v2855_v32   ;;  %3099 = vst [vmem:[%s3735_s18 + $0x158] sm:$0xff] %v2995_v33   ;;  %v1606_v44 = vmax.f32 %v1256_v36, 0.0  ;;  %v1662_v45 = vmax.f32 %v1480_v37, 0.0 }
 0x181   : > { %v1258_v38 = vpop.f32.mrf.mxu0  ;;  %v1482_v39 = vpop.f32.mrf.mxu1 }
 0x182   : > { %v1259_v40 = vadd.f32 %v3718_v49, %v1258_v38  ;;  %v1483_v41 = vadd.f32 %v3718_v49, %v1482_v39 }
 0x183   : > { %v1260_v42 = vpop.f32.mrf.mxu0  ;;  %v1484_v43 = vpop.f32.mrf.mxu1 }
 0x184   : > { %v1607_v46 = vmax.f32 %v1259_v40, 0.0  ;;  %v1663_v47 = vmax.f32 %v1483_v41, 0.0 }
 0x185   : > { %v1263_v48 = vpop.f32.mrf.mxu0  ;;  %v1487_v50 = vpop.f32.mrf.mxu1 }
 0x186   : > { %v2860_v51 = vpack.c.bf16 %v1607_v46, %v1606_v44  ;;  %v3000_v52 = vpack.c.bf16 %v1663_v47, %v1662_v45  ;;  %v1264_v55 = vadd.f32 %v3718_v49, %v1263_v48  ;;  %v1488_v56 = vadd.f32 %v3718_v49, %v1487_v50 }
 0x187   : > { %v1265_v53 = vpop.f32.mrf.mxu0  ;;  %v1489_v54 = vpop.f32.mrf.mxu1 }
 0x188   : > { %3072 = vst [vmem:[%s3735_s18 + $0x80] sm:$0xff] %v2860_v51   ;;  %3100 = vst [vmem:[%s3735_s18 + $0x160] sm:$0xff] %v3000_v52   ;;  %v1608_v63 = vmax.f32 %v1264_v55, 0.0  ;;  %v1664_v0 = vmax.f32 %v1488_v56, 0.0 }
 0x189   : > { %v1266_v57 = vpop.f32.mrf.mxu0  ;;  %v1490_v58 = vpop.f32.mrf.mxu1 }
 0x18a   : > { %v1267_v59 = vadd.f32 %v3718_v49, %v1266_v57  ;;  %v1491_v60 = vadd.f32 %v3718_v49, %v1490_v58 }
 0x18b   : > { %v1268_v61 = vpop.f32.mrf.mxu0  ;;  %v1492_v62 = vpop.f32.mrf.mxu1 }
 0x18c   : > { %v1609_v1 = vmax.f32 %v1267_v59, 0.0  ;;  %v1665_v2 = vmax.f32 %v1491_v60, 0.0 }
 0x18d   : > { %v1271_v3 = vpop.f32.mrf.mxu0  ;;  %v1495_v4 = vpop.f32.mrf.mxu1 }
 0x18e   : > { %v2865_v5 = vpack.c.bf16 %v1609_v1, %v1608_v63  ;;  %v3005_v6 = vpack.c.bf16 %v1665_v2, %v1664_v0  ;;  %v1272_v9 = vadd.f32 %v3718_v49, %v1271_v3  ;;  %v1496_v10 = vadd.f32 %v3718_v49, %v1495_v4 }
 0x18f   : > { %v1273_v7 = vpop.f32.mrf.mxu0  ;;  %v1497_v8 = vpop.f32.mrf.mxu1 }
 0x190   : > { %3073 = vst [vmem:[%s3735_s18 + $0x88] sm:$0xff] %v2865_v5   ;;  %3101 = vst [vmem:[%s3735_s18 + $0x168] sm:$0xff] %v3005_v6   ;;  %v1610_v17 = vmax.f32 %v1272_v9, 0.0  ;;  %v1666_v18 = vmax.f32 %v1496_v10, 0.0 }
 0x191   : > { %v1274_v11 = vpop.f32.mrf.mxu0  ;;  %v1498_v12 = vpop.f32.mrf.mxu1 }
 0x192   : > { %v1275_v13 = vadd.f32 %v3718_v49, %v1274_v11  ;;  %v1499_v14 = vadd.f32 %v3718_v49, %v1498_v12 }
 0x193   : > { %v1276_v15 = vpop.f32.mrf.mxu0  ;;  %v1500_v16 = vpop.f32.mrf.mxu1 }
 0x194   : > { %v1611_v19 = vmax.f32 %v1275_v13, 0.0  ;;  %v1667_v20 = vmax.f32 %v1499_v14, 0.0 }
 0x195   : > { %v1279_v21 = vpop.f32.mrf.mxu0  ;;  %v1503_v22 = vpop.f32.mrf.mxu1 }
 0x196   : > { %v2870_v23 = vpack.c.bf16 %v1611_v19, %v1610_v17  ;;  %v3010_v24 = vpack.c.bf16 %v1667_v20, %v1666_v18  ;;  %v1280_v27 = vadd.f32 %v3718_v49, %v1279_v21  ;;  %v1504_v28 = vadd.f32 %v3718_v49, %v1503_v22 }
 0x197   : > { %v1281_v25 = vpop.f32.mrf.mxu0  ;;  %v1505_v26 = vpop.f32.mrf.mxu1 }
 0x198   : > { %3074 = vst [vmem:[%s3735_s18 + $0x90] sm:$0xff] %v2870_v23   ;;  %3102 = vst [vmem:[%s3735_s18 + $0x170] sm:$0xff] %v3010_v24   ;;  %v1612_v35 = vmax.f32 %v1280_v27, 0.0  ;;  %v1668_v36 = vmax.f32 %v1504_v28, 0.0 }
 0x199   : > { %v1282_v29 = vpop.f32.mrf.mxu0  ;;  %v1506_v30 = vpop.f32.mrf.mxu1 }
 0x19a   : > { %v1283_v31 = vadd.f32 %v3718_v49, %v1282_v29  ;;  %v1507_v32 = vadd.f32 %v3718_v49, %v1506_v30 }
 0x19b   : > { %v1284_v33 = vpop.f32.mrf.mxu0  ;;  %v1508_v34 = vpop.f32.mrf.mxu1 }
 0x19c   : > { %v1613_v37 = vmax.f32 %v1283_v31, 0.0  ;;  %v1669_v38 = vmax.f32 %v1507_v32, 0.0 }
 0x19d   : > { %v1287_v39 = vpop.f32.mrf.mxu0  ;;  %v1511_v40 = vpop.f32.mrf.mxu1 }
 0x19e   : > { %v2875_v41 = vpack.c.bf16 %v1613_v37, %v1612_v35  ;;  %v3015_v42 = vpack.c.bf16 %v1669_v38, %v1668_v36  ;;  %v1288_v45 = vadd.f32 %v3718_v49, %v1287_v39  ;;  %v1512_v46 = vadd.f32 %v3718_v49, %v1511_v40 }
 0x19f   : > { %v1289_v43 = vpop.f32.mrf.mxu0  ;;  %v1513_v44 = vpop.f32.mrf.mxu1 }
 0x1a0   : > { %3075 = vst [vmem:[%s3735_s18 + $0x98] sm:$0xff] %v2875_v41   ;;  %3103 = vst [vmem:[%s3735_s18 + $0x178] sm:$0xff] %v3015_v42   ;;  %v1614_v54 = vmax.f32 %v1288_v45, 0.0  ;;  %v1670_v55 = vmax.f32 %v1512_v46, 0.0 }
 0x1a1   : > { %v1290_v47 = vpop.f32.mrf.mxu0  ;;  %v1514_v48 = vpop.f32.mrf.mxu1 }
 0x1a2   : > { %v1291_v50 = vadd.f32 %v3718_v49, %v1290_v47  ;;  %v1515_v51 = vadd.f32 %v3718_v49, %v1514_v48 }
 0x1a3   : > { %v1292_v52 = vpop.f32.mrf.mxu0  ;;  %v1516_v53 = vpop.f32.mrf.mxu1 }
 0x1a4   : > { %v1615_v56 = vmax.f32 %v1291_v50, 0.0  ;;  %v1671_v57 = vmax.f32 %v1515_v51, 0.0 }
 0x1a5   : > { %v1295_v58 = vpop.f32.mrf.mxu0  ;;  %v1519_v59 = vpop.f32.mrf.mxu1 }
 0x1a6   : > { %v2880_v60 = vpack.c.bf16 %v1615_v56, %v1614_v54  ;;  %v3020_v61 = vpack.c.bf16 %v1671_v57, %v1670_v55  ;;  %v1296_v0 = vadd.f32 %v3718_v49, %v1295_v58  ;;  %v1520_v1 = vadd.f32 %v3718_v49, %v1519_v59  ;;  %v3888_v55 = vld [vmem:[%s3972_s2] ss:$0 sm:$0xff] }
 0x1a7   : > { %v1297_v62 = vpop.f32.mrf.mxu0  ;;  %v1521_v63 = vpop.f32.mrf.mxu1 }
 0x1a8   : > { %3076 = vst [vmem:[%s3735_s18 + $0xa0] sm:$0xff] %v2880_v60   ;;  %3104 = vst [vmem:[%s3735_s18 + $0x180] sm:$0xff] %v3020_v61   ;;  %v1616_v8 = vmax.f32 %v1296_v0, 0.0  ;;  %v1672_v9 = vmax.f32 %v1520_v1, 0.0 }
 0x1a9   : > { %v1298_v2 = vpop.f32.mrf.mxu0  ;;  %v1522_v3 = vpop.f32.mrf.mxu1 }
 0x1aa   : > { %v1299_v4 = vadd.f32 %v3718_v49, %v1298_v2  ;;  %v1523_v5 = vadd.f32 %v3718_v49, %v1522_v3 }
 0x1ab   : > { %v1300_v6 = vpop.f32.mrf.mxu0  ;;  %v1524_v7 = vpop.f32.mrf.mxu1 }
 0x1ac   : > { %v1617_v10 = vmax.f32 %v1299_v4, 0.0  ;;  %v1673_v11 = vmax.f32 %v1523_v5, 0.0 }
 0x1ad   : > { %v1303_v12 = vpop.f32.mrf.mxu0  ;;  %v1527_v13 = vpop.f32.mrf.mxu1 }
 0x1ae   : > { %v2885_v14 = vpack.c.bf16 %v1617_v10, %v1616_v8  ;;  %v3025_v15 = vpack.c.bf16 %v1673_v11, %v1672_v9  ;;  %v1304_v18 = vadd.f32 %v3718_v49, %v1303_v12  ;;  %v1528_v19 = vadd.f32 %v3718_v49, %v1527_v13 }
 0x1af   : > { %v1305_v16 = vpop.f32.mrf.mxu0  ;;  %v1529_v17 = vpop.f32.mrf.mxu1 }
 0x1b0   : > { %3077 = vst [vmem:[%s3735_s18 + $0xa8] sm:$0xff] %v2885_v14   ;;  %3105 = vst [vmem:[%s3735_s18 + $0x188] sm:$0xff] %v3025_v15   ;;  %v1618_v26 = vmax.f32 %v1304_v18, 0.0  ;;  %v1674_v27 = vmax.f32 %v1528_v19, 0.0 }
 0x1b1   : > { %v1306_v20 = vpop.f32.mrf.mxu0  ;;  %v1530_v21 = vpop.f32.mrf.mxu1 }
 0x1b2   : > { %v1307_v22 = vadd.f32 %v3718_v49, %v1306_v20  ;;  %v1531_v23 = vadd.f32 %v3718_v49, %v1530_v21 }
 0x1b3   : > { %v1308_v24 = vpop.f32.mrf.mxu0  ;;  %v1532_v25 = vpop.f32.mrf.mxu1 }
 0x1b4   : > { %v1619_v28 = vmax.f32 %v1307_v22, 0.0  ;;  %v1675_v29 = vmax.f32 %v1531_v23, 0.0 }
 0x1b5   : > { %v1311_v30 = vpop.f32.mrf.mxu0  ;;  %v1535_v31 = vpop.f32.mrf.mxu1 }
 0x1b6   : > { %v2890_v32 = vpack.c.bf16 %v1619_v28, %v1618_v26  ;;  %v3030_v33 = vpack.c.bf16 %v1675_v29, %v1674_v27  ;;  %v1312_v36 = vadd.f32 %v3718_v49, %v1311_v30  ;;  %v1536_v37 = vadd.f32 %v3718_v49, %v1535_v31 }
 0x1b7   : > { %v1313_v34 = vpop.f32.mrf.mxu0  ;;  %v1537_v35 = vpop.f32.mrf.mxu1 }
 0x1b8   : > { %3078 = vst [vmem:[%s3735_s18 + $0xb0] sm:$0xff] %v2890_v32   ;;  %3106 = vst [vmem:[%s3735_s18 + $0x190] sm:$0xff] %v3030_v33   ;;  %v1620_v44 = vmax.f32 %v1312_v36, 0.0  ;;  %v1676_v45 = vmax.f32 %v1536_v37, 0.0 }
 0x1b9   : > { %v1314_v38 = vpop.f32.mrf.mxu0  ;;  %v1538_v39 = vpop.f32.mrf.mxu1 }
 0x1ba   : > { %v1315_v40 = vadd.f32 %v3718_v49, %v1314_v38  ;;  %v1539_v41 = vadd.f32 %v3718_v49, %v1538_v39 }
 0x1bb   : > { %v1316_v42 = vpop.f32.mrf.mxu0  ;;  %v1540_v43 = vpop.f32.mrf.mxu1 }
 0x1bc   : > { %v1621_v46 = vmax.f32 %v1315_v40, 0.0  ;;  %v1677_v47 = vmax.f32 %v1539_v41, 0.0 }
 0x1bd   : > { %v1319_v48 = vpop.f32.mrf.mxu0  ;;  %v1543_v50 = vpop.f32.mrf.mxu1 }
 0x1be   : > { %v2895_v51 = vpack.c.bf16 %v1621_v46, %v1620_v44  ;;  %v3035_v52 = vpack.c.bf16 %v1677_v47, %v1676_v45  ;;  %v1320_v49 = vadd.f32 %v3888_v55, %v1319_v48  ;;  %v1544_v56 = vadd.f32 %v3888_v55, %v1543_v50 }
 0x1bf   : > { %v1321_v53 = vpop.f32.mrf.mxu0  ;;  %v1545_v54 = vpop.f32.mrf.mxu1 }
 0x1c0   : > { %3079 = vst [vmem:[%s3735_s18 + $0xb8] sm:$0xff] %v2895_v51   ;;  %3107 = vst [vmem:[%s3735_s18 + $0x198] sm:$0xff] %v3035_v52   ;;  %v1622_v63 = vmax.f32 %v1320_v49, 0.0  ;;  %v1678_v0 = vmax.f32 %v1544_v56, 0.0 }
 0x1c1   : > { %v1322_v57 = vpop.f32.mrf.mxu0  ;;  %v1546_v58 = vpop.f32.mrf.mxu1 }
 0x1c2   : > { %v1323_v59 = vadd.f32 %v3888_v55, %v1322_v57  ;;  %v1547_v60 = vadd.f32 %v3888_v55, %v1546_v58 }
 0x1c3   : > { %v1324_v61 = vpop.f32.mrf.mxu0  ;;  %v1548_v62 = vpop.f32.mrf.mxu1 }
 0x1c4   : > { %v1623_v1 = vmax.f32 %v1323_v59, 0.0  ;;  %v1679_v2 = vmax.f32 %v1547_v60, 0.0 }
 0x1c5   : > { %v1327_v3 = vpop.f32.mrf.mxu0  ;;  %v1551_v4 = vpop.f32.mrf.mxu1 }
 0x1c6   : > { %v2900_v5 = vpack.c.bf16 %v1623_v1, %v1622_v63  ;;  %v3040_v6 = vpack.c.bf16 %v1679_v2, %v1678_v0  ;;  %v1328_v9 = vadd.f32 %v3888_v55, %v1327_v3  ;;  %v1552_v10 = vadd.f32 %v3888_v55, %v1551_v4 }
 0x1c7   : > { %v1329_v7 = vpop.f32.mrf.mxu0  ;;  %v1553_v8 = vpop.f32.mrf.mxu1 }
 0x1c8   : > { %3080 = vst [vmem:[%s3735_s18 + $0xc0] sm:$0xff] %v2900_v5   ;;  %3108 = vst [vmem:[%s3735_s18 + $0x1a0] sm:$0xff] %v3040_v6   ;;  %v1624_v17 = vmax.f32 %v1328_v9, 0.0  ;;  %v1680_v18 = vmax.f32 %v1552_v10, 0.0 }
 0x1c9   : > { %v1330_v11 = vpop.f32.mrf.mxu0  ;;  %v1554_v12 = vpop.f32.mrf.mxu1 }
 0x1ca   : > { %v1331_v13 = vadd.f32 %v3888_v55, %v1330_v11  ;;  %v1555_v14 = vadd.f32 %v3888_v55, %v1554_v12 }
 0x1cb   : > { %v1332_v15 = vpop.f32.mrf.mxu0  ;;  %v1556_v16 = vpop.f32.mrf.mxu1 }
 0x1cc   : > { %v1625_v19 = vmax.f32 %v1331_v13, 0.0  ;;  %v1681_v20 = vmax.f32 %v1555_v14, 0.0 }
 0x1cd   : > { %v1335_v21 = vpop.f32.mrf.mxu0  ;;  %v1559_v22 = vpop.f32.mrf.mxu1 }
 0x1ce   : > { %v2905_v23 = vpack.c.bf16 %v1625_v19, %v1624_v17  ;;  %v3045_v24 = vpack.c.bf16 %v1681_v20, %v1680_v18  ;;  %v1336_v27 = vadd.f32 %v3888_v55, %v1335_v21  ;;  %v1560_v28 = vadd.f32 %v3888_v55, %v1559_v22 }
 0x1cf   : > { %v1337_v25 = vpop.f32.mrf.mxu0  ;;  %v1561_v26 = vpop.f32.mrf.mxu1 }
 0x1d0   : > { %3081 = vst [vmem:[%s3735_s18 + $0xc8] sm:$0xff] %v2905_v23   ;;  %3109 = vst [vmem:[%s3735_s18 + $0x1a8] sm:$0xff] %v3045_v24   ;;  %v1626_v35 = vmax.f32 %v1336_v27, 0.0  ;;  %v1682_v36 = vmax.f32 %v1560_v28, 0.0 }
 0x1d1   : > { %v1338_v29 = vpop.f32.mrf.mxu0  ;;  %v1562_v30 = vpop.f32.mrf.mxu1 }
 0x1d2   : > { %v1339_v31 = vadd.f32 %v3888_v55, %v1338_v29  ;;  %v1563_v32 = vadd.f32 %v3888_v55, %v1562_v30 }
 0x1d3   : > { %v1340_v33 = vpop.f32.mrf.mxu0  ;;  %v1564_v34 = vpop.f32.mrf.mxu1 }
 0x1d4   : > { %v1627_v37 = vmax.f32 %v1339_v31, 0.0  ;;  %v1683_v38 = vmax.f32 %v1563_v32, 0.0 }
 0x1d5   : > { %v1343_v39 = vpop.f32.mrf.mxu0  ;;  %v1567_v40 = vpop.f32.mrf.mxu1 }
 0x1d6   : > { %v2910_v41 = vpack.c.bf16 %v1627_v37, %v1626_v35  ;;  %v3050_v42 = vpack.c.bf16 %v1683_v38, %v1682_v36  ;;  %v1344_v45 = vadd.f32 %v3888_v55, %v1343_v39  ;;  %v1568_v46 = vadd.f32 %v3888_v55, %v1567_v40 }
 0x1d7   : > { %v1345_v43 = vpop.f32.mrf.mxu0  ;;  %v1569_v44 = vpop.f32.mrf.mxu1 }
 0x1d8   : > { %3082 = vst [vmem:[%s3735_s18 + $0xd0] sm:$0xff] %v2910_v41   ;;  %3110 = vst [vmem:[%s3735_s18 + $0x1b0] sm:$0xff] %v3050_v42   ;;  %v1628_v54 = vmax.f32 %v1344_v45, 0.0  ;;  %v1684_v49 = vmax.f32 %v1568_v46, 0.0 }
 0x1d9   : > { %v1346_v47 = vpop.f32.mrf.mxu0  ;;  %v1570_v48 = vpop.f32.mrf.mxu1 }
 0x1da   : > { %v1347_v50 = vadd.f32 %v3888_v55, %v1346_v47  ;;  %v1571_v51 = vadd.f32 %v3888_v55, %v1570_v48 }
 0x1db   : > { %v1348_v52 = vpop.f32.mrf.mxu0  ;;  %v1572_v53 = vpop.f32.mrf.mxu1 }
 0x1dc   : > { %v1629_v56 = vmax.f32 %v1347_v50, 0.0  ;;  %v1685_v57 = vmax.f32 %v1571_v51, 0.0 }
 0x1de   : > { %v2915_v58 = vpack.c.bf16 %v1629_v56, %v1628_v54  ;;  %v3055_v55 = vpack.c.bf16 %v1685_v57, %v1684_v49 }
 0x1e0   : > { %3083 = vst [vmem:[%s3735_s18 + $0xd8] sm:$0xff] %v2915_v58   ;;  %3111 = vst [vmem:[%s3735_s18 + $0x1b8] sm:$0xff] %v3055_v55  }
 0x1e1   : > { %3383 = shalt.err (!%p3380_p5)
}
 0x1e2   : > { %s3384_s6 = scalar_lea.hbm %s3917_s28, 7168  ;;  %s3388_s10 = scalar_lea.hbm %s3973_s3, 200704 }
 0x1e3   : > { %p3385_p6 = scmp.ne.s32.totalorder %s3917_s28, %s3384_s6  ;;  %p3389_p10 = scmp.lt.s32.totalorder %s3917_s28, %s3973_s3 }
 0x1e4   : > { %p3390_p11 = scmp.lt.s32.totalorder %s3388_s10, %s3384_s6 }
 0x1e5   : > { %p3386_p7 = pnand %p3385_p6, %p3512_p4 }
 0x1e6   : > { %p3391_p12 = por %p3390_p11, %p3389_p10 }
 0x1e7   : > { %p3387_p9 = pneg %p3386_p7 }
 0x1e9   : > { %p3392_p13 = pnand %p3391_p12, %p3387_p9 }
 0x1eb   : > { %3395 = shalt.err (!%p3392_p13)
}
 0x1ec   : > { %s3450_s9 = smov 64   ;;  %s3451_s19 = smov 4  }
 0x1ed   : > { %3133 = dma.vmem_to_hbm [thread:$0]  (%p3512_p4), %s3919_s23, 7168, %s3917_s28, %s3925_s15, %s3450_s9, %s3450_s9, %s3451_s19  }
 0x1ee PF: > { %p3139_p0 = scmp.ge.s32.totalorder %s3446_s17, 2  ;;  %s2276_s21 = sand.u32 1, %s3426_s12  }
 0x1ef   : > { %s2277_s26 = scalar_lea.sflag [#allocation3], %s2276_s21 }
 0x1f0   : > { %p3136_p1 = pnand %p3139_p0, %p3519_p8 }
 0x1f2   : > { %p3137_p2 = pneg %p3136_p1 }
 0x1f4   : > { %3421 = dma.done.wait (%p3137_p2), %s2277_s26, 7168  }
 0x1f5   : > { %3423 = vsyncadd (%p3137_p2), %s2277_s26, 4294960128  ;;  %s16_s17 = sadd.s32 1, %s3446_s17   ;;  %s3976_s12 = smov %s3430_s13 }
 0x1f6   : > { %p13_p3 = scmp.ge.s32.totalorder %s16_s17, 30   ;;  %s3977_s13 = smov %s3434_s14 }
 0x1f7   : > { %s3978_s14 = smov %s3525_s25  ;;  %s3979_s15 = smov %s3442_s16 }
 0x1f8   : > { %s3980_s16 = smov %s3982_s20  ;;  %15 = sbr.rel (!%p13_p3) target bundleno = 4 (0x4), region = 73 }
 0x1fd   :  { %2282 = vsyncpa [#allocation3], 1 }
 0x1fe   :  { %2284 = vsyncpa [#allocation3 + $0x1], 1 }

</bundles_post_ra>
